<compile_context>
chip_gen: v5e
topology: v5e:2x2
jax: 0.10.0
libtpu: 0.0.40
codegen_flags: <defaults>
</compile_context>

<pallas_src>
import jax
import jax.numpy as jnp
import numpy as np
from jax import lax
from jax.experimental import pallas as pl
from jax.experimental.pallas import tpu as pltpu

NUM_TOKENS = 10
RNN_SIZE = 256            # GRU input size
HIDDEN = RNN_SIZE // 4    # 64, GRU hidden size
GATES = 3 * HIDDEN        # 192  (r | z | n, PyTorch gate order)


def _round_up(v, m):
    return ((v + m - 1) // m) * m


# --------------------------------------------------------------------------
# Kernel: one (Bt, T) batch slab per grid step — full GRU over time + linear.
#   x_ref   : (T, Bt, 256)  bf16   (time-major so gx scratch needs no transpose)
#   out_ref : (Bt, 10)      f32
#   gx_ref  : (T, Bt, 192)  f32 scratch (input projection for all timesteps)
# --------------------------------------------------------------------------
def gru_gst_kernel(x_ref, wih_ref, bih_ref, whh_ref, bhh_ref,
                   wlin_ref, blin_ref, out_ref, gx_ref):
    T, Bt, _ = x_ref.shape

    # ---- input projection for all timesteps: one fused bf16 MXU matmul -----
    x_flat = x_ref[...].reshape(T * Bt, RNN_SIZE)              # bf16, free reshape
    gx = (jnp.dot(x_flat, wih_ref[...],
                  preferred_element_type=jnp.float32)
          + bih_ref[...])                                      # (T*Bt, 192) f32
    gx_ref[...] = gx.reshape(T, Bt, GATES)                     # dense scratch

    whh = whh_ref[...]                                         # (64, 192) f32
    bhh = bhh_ref[...]                                         # (1, 192)  f32

    # ---- sequential GRU recurrence (PyTorch gate equations, f32) ------------
    # r = sigmoid(Wx_r + Wh_r h + b);  z = sigmoid(Wx_z + Wh_z h + b)
    # n = tanh(Wx_n + r * (Wh_n h + b_hn));  h' = z*(h - n) + n
    def step(t, h):                                            # h: (Bt, 64)
        gx_t = gx_ref[t]                                       # (Bt, 192) dense load
        gh = jnp.dot(h, whh, preferred_element_type=jnp.float32) + bhh
        r = jax.nn.sigmoid(gx_t[:, 0:HIDDEN] + gh[:, 0:HIDDEN])
        z = jax.nn.sigmoid(gx_t[:, HIDDEN:2 * HIDDEN]
                           + gh[:, HIDDEN:2 * HIDDEN])
        n = jnp.tanh(gx_t[:, 2 * HIDDEN:GATES] + r * gh[:, 2 * HIDDEN:GATES])
        return z * (h - n) + n

    h_last = lax.fori_loop(0, T, step,
                           jnp.zeros((Bt, HIDDEN), jnp.float32),
                           unroll=min(T, 8))

    # ---- final linear on the last hidden state ------------------------------
    out_ref[...] = (jnp.dot(h_last, wlin_ref[...],
                            preferred_element_type=jnp.float32)
                    + blin_ref[...])                           # (Bt, 10)


# --------------------------------------------------------------------------
# Wrapper: choose a batch tile, pad, run the kernel, un-pad.
# --------------------------------------------------------------------------
def text_predicted_gst_forward(text_encoding, params):
    B, T, _ = text_encoding.shape

    # Batch tile: >=2 grid steps for moderate/large B (v7x megacore), capped at
    # 128 rows and rounded to the sublane packing (16 covers bf16 inputs too).
    if B <= 16:
        Bt = _round_up(B, 16)
    else:
        Bt = min(128, _round_up((B + 1) // 2, 16))
    B_pad = _round_up(B, Bt)
    grid = B_pad // Bt

    # bf16 input (halves the input DMA; matmul accumulates in f32), padded to
    # B_pad rows and laid out time-major so the kernel's gx scratch is dense.
    x = text_encoding.astype(jnp.bfloat16)
    if B_pad != B:
        x = jnp.pad(x, ((0, B_pad - B), (0, 0), (0, 0)))
    x_tbd = jnp.swapaxes(x, 0, 1)                              # (T, B_pad, 256)

    vmem = pl.BlockSpec(memory_space=pltpu.MemorySpace.VMEM)
    out = pl.pallas_call(
        gru_gst_kernel,
        out_shape=jax.ShapeDtypeStruct((B_pad, NUM_TOKENS), jnp.float32),
        grid=(grid,),
        in_specs=[
            pl.BlockSpec((T, Bt, RNN_SIZE), lambda b: (0, b, 0)),   # x (bf16)
            vmem,   # Wih_T  (256, 192) bf16
            vmem,   # bih    (1, 192)   f32
            vmem,   # Whh_T  (64, 192)  f32
            vmem,   # bhh    (1, 192)   f32
            vmem,   # Wlin_T (64, 10)   f32
            vmem,   # blin   (1, 10)    f32
        ],
        out_specs=pl.BlockSpec((Bt, NUM_TOKENS), lambda b: (b, 0)),
        scratch_shapes=[pltpu.VMEM((T, Bt, GATES), jnp.float32)],
        compiler_params=pltpu.CompilerParams(
            dimension_semantics=("parallel",)),
    )(x_tbd,
      params["Wih_T"].astype(jnp.bfloat16),
      params["bih"], params["Whh_T"], params["bhh"],
      params["Wlin_T"], params["blin"])

    return out[:B, None, :]                                    # (B, 1, 10)


# --------------------------------------------------------------------------
# Deterministic synthetic parameters (same shapes/semantics as the PyTorch
# module; GRU weights stored pre-transposed as (in_features, 3*hidden)).
# --------------------------------------------------------------------------
def make_params(key):
    ks = jax.random.split(key, 6)
    s = 1.0 / np.sqrt(HIDDEN)

    def u(k, shape):
        return jax.random.uniform(k, shape, jnp.float32, -s, s)

    return {
        "Wih_T": u(ks[0], (RNN_SIZE, GATES)),
        "Whh_T": u(ks[1], (HIDDEN, GATES)),
        "bih":   u(ks[2], (1, GATES)),
        "bhh":   u(ks[3], (1, GATES)),
        "Wlin_T": u(ks[4], (HIDDEN, NUM_TOKENS)),
        "blin":   u(ks[5], (1, NUM_TOKENS)),
    }


# --------------------------------------------------------------------------
# Pure-JAX f32 reference mirroring the PyTorch forward exactly.
# --------------------------------------------------------------------------
def text_predicted_gst_reference(x, params):
    B, T, _ = x.shape
    gx_all = jnp.einsum("bti,ig->btg", x, params["Wih_T"]) + params["bih"]

    def step(h, gx_t):
        gh = h @ params["Whh_T"] + params["bhh"]
        r = jax.nn.sigmoid(gx_t[:, :HIDDEN] + gh[:, :HIDDEN])
        z = jax.nn.sigmoid(gx_t[:, HIDDEN:2 * HIDDEN]
                           + gh[:, HIDDEN:2 * HIDDEN])
        n = jnp.tanh(gx_t[:, 2 * HIDDEN:] + r * gh[:, 2 * HIDDEN:])
        return (1.0 - z) * n + z * h, None

    h0 = jnp.zeros((B, HIDDEN), jnp.float32)
    h_last, _ = lax.scan(step, h0, jnp.swapaxes(gx_all, 0, 1))
    out = h_last @ params["Wlin_T"] + params["blin"]
    return out[:, None, :]


if __name__ == "__main__":
    B, T = 2, 8
    key = jax.random.PRNGKey(0)
    k_param, k_x = jax.random.split(key)

    params = make_params(k_param)
    x = jax.random.normal(k_x, (B, T, RNN_SIZE), jnp.float32)

    out = jax.block_until_ready(text_predicted_gst_forward(x, params))
    ref = jax.block_until_ready(text_predicted_gst_reference(x, params))

    assert out.shape == (B, 1, NUM_TOKENS)
    assert bool(jnp.all(jnp.isfinite(out)))
    # bf16 operands on the input projection (f32 accumulation) -> slightly
    # looser tolerance than a pure-f32 comparison.
    assert np.allclose(np.asarray(out), np.asarray(ref), atol=2e-2, rtol=2e-2)

    print("KERNEL_OK")
</pallas_src>

<mosaic_0001>
module attributes {stable_mosaic.version = 11 : i64} {
  func.func @gru_gst_kernel(%arg0: i32, %arg1: memref<8x16x256xbf16, #tpu.memory_space<vmem>>, %arg2: memref<256x192xbf16, #tpu.memory_space<vmem>>, %arg3: memref<1x192xf32, #tpu.memory_space<vmem>>, %arg4: memref<64x192xf32, #tpu.memory_space<vmem>>, %arg5: memref<1x192xf32, #tpu.memory_space<vmem>>, %arg6: memref<64x10xf32, #tpu.memory_space<vmem>>, %arg7: memref<1x10xf32, #tpu.memory_space<vmem>>, %arg8: memref<16x10xf32, #tpu.memory_space<vmem>>, %arg9: memref<8x16x192xf32, #tpu.memory_space<vmem>>) attributes {dimension_semantics = [#tpu.dimension_semantics<parallel>], iteration_bounds = array<i64: 1>, scalar_prefetch = 0 : i64, scratch_operands = 1 : i64, tpu.core_type = #tpu.core_type<tc>, window_params = [{transform_indices = @transform_0, window_bounds = array<i64: 8, 16, 256>}, {pipeline_mode = #tpu.pipeline_mode<synchronous>, transform_indices = @transform_1, window_bounds = array<i64: 256, 192>}, {pipeline_mode = #tpu.pipeline_mode<synchronous>, transform_indices = @transform_2, window_bounds = array<i64: 1, 192>}, {pipeline_mode = #tpu.pipeline_mode<synchronous>, transform_indices = @transform_3, window_bounds = array<i64: 64, 192>}, {pipeline_mode = #tpu.pipeline_mode<synchronous>, transform_indices = @transform_4, window_bounds = array<i64: 1, 192>}, {pipeline_mode = #tpu.pipeline_mode<synchronous>, transform_indices = @transform_5, window_bounds = array<i64: 64, 10>}, {pipeline_mode = #tpu.pipeline_mode<synchronous>, transform_indices = @transform_6, window_bounds = array<i64: 1, 10>}, {transform_indices = @transform_7, window_bounds = array<i64: 16, 10>}]} {
    %c0 = arith.constant 0 : index
    %c0_0 = arith.constant 0 : index
    %c0_1 = arith.constant 0 : index
    %0 = vector.load %arg1[%c0, %c0_0, %c0_1] : memref<8x16x256xbf16, #tpu.memory_space<vmem>>, vector<8x16x256xbf16>
    %1 = vector.shape_cast %0 : vector<8x16x256xbf16> to vector<128x256xbf16>
    %c0_2 = arith.constant 0 : index
    %c0_3 = arith.constant 0 : index
    %2 = vector.load %arg2[%c0_2, %c0_3] : memref<256x192xbf16, #tpu.memory_space<vmem>>, vector<256x192xbf16>
    %cst = arith.constant dense<0.000000e+00> : vector<128x192xf32>
    %3 = tpu.matmul %1, %2, %cst {dimension_numbers = #tpu.dot_dimension_numbers<[1], [0], [0], [1], [0, 0, 1, 1], [], []>} : vector<128x256xbf16>, vector<256x192xbf16>, vector<128x192xf32> -> vector<128x192xf32>
    %c0_4 = arith.constant 0 : index
    %c0_5 = arith.constant 0 : index
    %4 = vector.load %arg3[%c0_4, %c0_5] : memref<1x192xf32, #tpu.memory_space<vmem>>, vector<1x192xf32>
    %5 = vector.broadcast %4 : vector<1x192xf32> to vector<128x192xf32>
    %6 = arith.addf %3, %5 : vector<128x192xf32>
    %7 = vector.shape_cast %6 : vector<128x192xf32> to vector<8x16x192xf32>
    %c0_6 = arith.constant 0 : index
    %c0_7 = arith.constant 0 : index
    %c0_8 = arith.constant 0 : index
    %8 = vector.load %arg9[%c0_6, %c0_7, %c0_8] : memref<8x16x192xf32, #tpu.memory_space<vmem>>, vector<8x16x192xf32>
    tpu.vector_store %arg9[%c0_6, %c0_7, %c0_8], %7 {strides = array<i32>} : memref<8x16x192xf32, #tpu.memory_space<vmem>>, vector<8x16x192xf32>,
    %c0_9 = arith.constant 0 : index
    %c0_10 = arith.constant 0 : index
    %9 = vector.load %arg4[%c0_9, %c0_10] : memref<64x192xf32, #tpu.memory_space<vmem>>, vector<64x192xf32>
    %c0_11 = arith.constant 0 : index
    %c0_12 = arith.constant 0 : index
    %10 = vector.load %arg5[%c0_11, %c0_12] : memref<1x192xf32, #tpu.memory_space<vmem>>, vector<1x192xf32>
    %cst_13 = arith.constant 0.000000e+00 : f32
    %11 = vector.broadcast %cst_13 : f32 to vector<16x64xf32>
    %c0_i32 = arith.constant 0 : i32
    %12 = arith.index_cast %c0_i32 : i32 to index
    %c0_14 = arith.constant 0 : index
    %c0_15 = arith.constant 0 : index
    %13 = vector.load %arg9[%12, %c0_14, %c0_15] : memref<8x16x192xf32, #tpu.memory_space<vmem>>, vector<1x16x192xf32>
    %14 = vector.shape_cast %13 : vector<1x16x192xf32> to vector<16x192xf32>
    %cst_16 = arith.constant dense<0.000000e+00> : vector<16x192xf32>
    %15 = tpu.matmul %11, %9, %cst_16 {dimension_numbers = #tpu.dot_dimension_numbers<[1], [0], [0], [1], [0, 0, 1, 1], [], []>} : vector<16x64xf32>, vector<64x192xf32>, vector<16x192xf32> -> vector<16x192xf32>
    %16 = vector.broadcast %10 : vector<1x192xf32> to vector<16x192xf32>
    %17 = arith.addf %15, %16 : vector<16x192xf32>
    %18 = vector.extract_strided_slice %14 {offsets = [0, 0], sizes = [16, 64], strides = [1, 1]} : vector<16x192xf32> to vector<16x64xf32>
    %19 = vector.extract_strided_slice %17 {offsets = [0, 0], sizes = [16, 64], strides = [1, 1]} : vector<16x192xf32> to vector<16x64xf32>
    %20 = arith.addf %18, %19 : vector<16x64xf32>
    %21 = arith.negf %20 : vector<16x64xf32>
    %22 = math.exp %21 : vector<16x64xf32>
    %cst_17 = arith.constant 1.000000e+00 : f32
    %23 = vector.broadcast %cst_17 : f32 to vector<16x64xf32>
    %24 = arith.addf %23, %22 : vector<16x64xf32>
    %25 = arith.divf %23, %24 : vector<16x64xf32>
    %26 = vector.extract_strided_slice %14 {offsets = [0, 64], sizes = [16, 64], strides = [1, 1]} : vector<16x192xf32> to vector<16x64xf32>
    %27 = vector.extract_strided_slice %17 {offsets = [0, 64], sizes = [16, 64], strides = [1, 1]} : vector<16x192xf32> to vector<16x64xf32>
    %28 = arith.addf %26, %27 : vector<16x64xf32>
    %29 = arith.negf %28 : vector<16x64xf32>
    %30 = math.exp %29 : vector<16x64xf32>
    %cst_18 = arith.constant 1.000000e+00 : f32
    %31 = vector.broadcast %cst_18 : f32 to vector<16x64xf32>
    %32 = arith.addf %31, %30 : vector<16x64xf32>
    %33 = arith.divf %31, %32 : vector<16x64xf32>
    %34 = vector.extract_strided_slice %14 {offsets = [0, 128], sizes = [16, 64], strides = [1, 1]} : vector<16x192xf32> to vector<16x64xf32>
    %35 = vector.extract_strided_slice %17 {offsets = [0, 128], sizes = [16, 64], strides = [1, 1]} : vector<16x192xf32> to vector<16x64xf32>
    %36 = arith.mulf %25, %35 : vector<16x64xf32>
    %37 = arith.addf %34, %36 : vector<16x64xf32>
    %38 = math.tanh %37 : vector<16x64xf32>
    %39 = arith.subf %11, %38 : vector<16x64xf32>
    %40 = arith.mulf %33, %39 : vector<16x64xf32>
    %41 = arith.addf %40, %38 : vector<16x64xf32>
    %c1_i32 = arith.constant 1 : i32
    %42 = arith.index_cast %c1_i32 : i32 to index
    %c0_19 = arith.constant 0 : index
    %c0_20 = arith.constant 0 : index
    %43 = vector.load %arg9[%42, %c0_19, %c0_20] : memref<8x16x192xf32, #tpu.memory_space<vmem>>, vector<1x16x192xf32>
    %44 = vector.shape_cast %43 : vector<1x16x192xf32> to vector<16x192xf32>
    %cst_21 = arith.constant dense<0.000000e+00> : vector<16x192xf32>
    %45 = tpu.matmul %41, %9, %cst_21 {dimension_numbers = #tpu.dot_dimension_numbers<[1], [0], [0], [1], [0, 0, 1, 1], [], []>} : vector<16x64xf32>, vector<64x192xf32>, vector<16x192xf32> -> vector<16x192xf32>
    %46 = vector.broadcast %10 : vector<1x192xf32> to vector<16x192xf32>
    %47 = arith.addf %45, %46 : vector<16x192xf32>
    %48 = vector.extract_strided_slice %44 {offsets = [0, 0], sizes = [16, 64], strides = [1, 1]} : vector<16x192xf32> to vector<16x64xf32>
    %49 = vector.extract_strided_slice %47 {offsets = [0, 0], sizes = [16, 64], strides = [1, 1]} : vector<16x192xf32> to vector<16x64xf32>
    %50 = arith.addf %48, %49 : vector<16x64xf32>
    %51 = arith.negf %50 : vector<16x64xf32>
    %52 = math.exp %51 : vector<16x64xf32>
    %cst_22 = arith.constant 1.000000e+00 : f32
    %53 = vector.broadcast %cst_22 : f32 to vector<16x64xf32>
    %54 = arith.addf %53, %52 : vector<16x64xf32>
    %55 = arith.divf %53, %54 : vector<16x64xf32>
    %56 = vector.extract_strided_slice %44 {offsets = [0, 64], sizes = [16, 64], strides = [1, 1]} : vector<16x192xf32> to vector<16x64xf32>
    %57 = vector.extract_strided_slice %47 {offsets = [0, 64], sizes = [16, 64], strides = [1, 1]} : vector<16x192xf32> to vector<16x64xf32>
    %58 = arith.addf %56, %57 : vector<16x64xf32>
    %59 = arith.negf %58 : vector<16x64xf32>
    %60 = math.exp %59 : vector<16x64xf32>
    %cst_23 = arith.constant 1.000000e+00 : f32
    %61 = vector.broadcast %cst_23 : f32 to vector<16x64xf32>
    %62 = arith.addf %61, %60 : vector<16x64xf32>
    %63 = arith.divf %61, %62 : vector<16x64xf32>
    %64 = vector.extract_strided_slice %44 {offsets = [0, 128], sizes = [16, 64], strides = [1, 1]} : vector<16x192xf32> to vector<16x64xf32>
    %65 = vector.extract_strided_slice %47 {offsets = [0, 128], sizes = [16, 64], strides = [1, 1]} : vector<16x192xf32> to vector<16x64xf32>
    %66 = arith.mulf %55, %65 : vector<16x64xf32>
    %67 = arith.addf %64, %66 : vector<16x64xf32>
    %68 = math.tanh %67 : vector<16x64xf32>
    %69 = arith.subf %41, %68 : vector<16x64xf32>
    %70 = arith.mulf %63, %69 : vector<16x64xf32>
    %71 = arith.addf %70, %68 : vector<16x64xf32>
    %c2_i32 = arith.constant 2 : i32
    %72 = arith.index_cast %c2_i32 : i32 to index
    %c0_24 = arith.constant 0 : index
    %c0_25 = arith.constant 0 : index
    %73 = vector.load %arg9[%72, %c0_24, %c0_25] : memref<8x16x192xf32, #tpu.memory_space<vmem>>, vector<1x16x192xf32>
    %74 = vector.shape_cast %73 : vector<1x16x192xf32> to vector<16x192xf32>
    %cst_26 = arith.constant dense<0.000000e+00> : vector<16x192xf32>
    %75 = tpu.matmul %71, %9, %cst_26 {dimension_numbers = #tpu.dot_dimension_numbers<[1], [0], [0], [1], [0, 0, 1, 1], [], []>} : vector<16x64xf32>, vector<64x192xf32>, vector<16x192xf32> -> vector<16x192xf32>
    %76 = vector.broadcast %10 : vector<1x192xf32> to vector<16x192xf32>
    %77 = arith.addf %75, %76 : vector<16x192xf32>
    %78 = vector.extract_strided_slice %74 {offsets = [0, 0], sizes = [16, 64], strides = [1, 1]} : vector<16x192xf32> to vector<16x64xf32>
    %79 = vector.extract_strided_slice %77 {offsets = [0, 0], sizes = [16, 64], strides = [1, 1]} : vector<16x192xf32> to vector<16x64xf32>
    %80 = arith.addf %78, %79 : vector<16x64xf32>
    %81 = arith.negf %80 : vector<16x64xf32>
    %82 = math.exp %81 : vector<16x64xf32>
    %cst_27 = arith.constant 1.000000e+00 : f32
    %83 = vector.broadcast %cst_27 : f32 to vector<16x64xf32>
    %84 = arith.addf %83, %82 : vector<16x64xf32>
    %85 = arith.divf %83, %84 : vector<16x64xf32>
    %86 = vector.extract_strided_slice %74 {offsets = [0, 64], sizes = [16, 64], strides = [1, 1]} : vector<16x192xf32> to vector<16x64xf32>
    %87 = vector.extract_strided_slice %77 {offsets = [0, 64], sizes = [16, 64], strides = [1, 1]} : vector<16x192xf32> to vector<16x64xf32>
    %88 = arith.addf %86, %87 : vector<16x64xf32>
    %89 = arith.negf %88 : vector<16x64xf32>
    %90 = math.exp %89 : vector<16x64xf32>
    %cst_28 = arith.constant 1.000000e+00 : f32
    %91 = vector.broadcast %cst_28 : f32 to vector<16x64xf32>
    %92 = arith.addf %91, %90 : vector<16x64xf32>
    %93 = arith.divf %91, %92 : vector<16x64xf32>
    %94 = vector.extract_strided_slice %74 {offsets = [0, 128], sizes = [16, 64], strides = [1, 1]} : vector<16x192xf32> to vector<16x64xf32>
    %95 = vector.extract_strided_slice %77 {offsets = [0, 128], sizes = [16, 64], strides = [1, 1]} : vector<16x192xf32> to vector<16x64xf32>
    %96 = arith.mulf %85, %95 : vector<16x64xf32>
    %97 = arith.addf %94, %96 : vector<16x64xf32>
    %98 = math.tanh %97 : vector<16x64xf32>
    %99 = arith.subf %71, %98 : vector<16x64xf32>
    %100 = arith.mulf %93, %99 : vector<16x64xf32>
    %101 = arith.addf %100, %98 : vector<16x64xf32>
    %c3_i32 = arith.constant 3 : i32
    %102 = arith.index_cast %c3_i32 : i32 to index
    %c0_29 = arith.constant 0 : index
    %c0_30 = arith.constant 0 : index
    %103 = vector.load %arg9[%102, %c0_29, %c0_30] : memref<8x16x192xf32, #tpu.memory_space<vmem>>, vector<1x16x192xf32>
    %104 = vector.shape_cast %103 : vector<1x16x192xf32> to vector<16x192xf32>
    %cst_31 = arith.constant dense<0.000000e+00> : vector<16x192xf32>
    %105 = tpu.matmul %101, %9, %cst_31 {dimension_numbers = #tpu.dot_dimension_numbers<[1], [0], [0], [1], [0, 0, 1, 1], [], []>} : vector<16x64xf32>, vector<64x192xf32>, vector<16x192xf32> -> vector<16x192xf32>
    %106 = vector.broadcast %10 : vector<1x192xf32> to vector<16x192xf32>
    %107 = arith.addf %105, %106 : vector<16x192xf32>
    %108 = vector.extract_strided_slice %104 {offsets = [0, 0], sizes = [16, 64], strides = [1, 1]} : vector<16x192xf32> to vector<16x64xf32>
    %109 = vector.extract_strided_slice %107 {offsets = [0, 0], sizes = [16, 64], strides = [1, 1]} : vector<16x192xf32> to vector<16x64xf32>
    %110 = arith.addf %108, %109 : vector<16x64xf32>
    %111 = arith.negf %110 : vector<16x64xf32>
    %112 = math.exp %111 : vector<16x64xf32>
    %cst_32 = arith.constant 1.000000e+00 : f32
    %113 = vector.broadcast %cst_32 : f32 to vector<16x64xf32>
    %114 = arith.addf %113, %112 : vector<16x64xf32>
    %115 = arith.divf %113, %114 : vector<16x64xf32>
    %116 = vector.extract_strided_slice %104 {offsets = [0, 64], sizes = [16, 64], strides = [1, 1]} : vector<16x192xf32> to vector<16x64xf32>
    %117 = vector.extract_strided_slice %107 {offsets = [0, 64], sizes = [16, 64], strides = [1, 1]} : vector<16x192xf32> to vector<16x64xf32>
    %118 = arith.addf %116, %117 : vector<16x64xf32>
    %119 = arith.negf %118 : vector<16x64xf32>
    %120 = math.exp %119 : vector<16x64xf32>
    %cst_33 = arith.constant 1.000000e+00 : f32
    %121 = vector.broadcast %cst_33 : f32 to vector<16x64xf32>
    %122 = arith.addf %121, %120 : vector<16x64xf32>
    %123 = arith.divf %121, %122 : vector<16x64xf32>
    %124 = vector.extract_strided_slice %104 {offsets = [0, 128], sizes = [16, 64], strides = [1, 1]} : vector<16x192xf32> to vector<16x64xf32>
    %125 = vector.extract_strided_slice %107 {offsets = [0, 128], sizes = [16, 64], strides = [1, 1]} : vector<16x192xf32> to vector<16x64xf32>
    %126 = arith.mulf %115, %125 : vector<16x64xf32>
    %127 = arith.addf %124, %126 : vector<16x64xf32>
    %128 = math.tanh %127 : vector<16x64xf32>
    %129 = arith.subf %101, %128 : vector<16x64xf32>
    %130 = arith.mulf %123, %129 : vector<16x64xf32>
    %131 = arith.addf %130, %128 : vector<16x64xf32>
    %c4_i32 = arith.constant 4 : i32
    %132 = arith.index_cast %c4_i32 : i32 to index
    %c0_34 = arith.constant 0 : index
    %c0_35 = arith.constant 0 : index
    %133 = vector.load %arg9[%132, %c0_34, %c0_35] : memref<8x16x192xf32, #tpu.memory_space<vmem>>, vector<1x16x192xf32>
    %134 = vector.shape_cast %133 : vector<1x16x192xf32> to vector<16x192xf32>
    %cst_36 = arith.constant dense<0.000000e+00> : vector<16x192xf32>
    %135 = tpu.matmul %131, %9, %cst_36 {dimension_numbers = #tpu.dot_dimension_numbers<[1], [0], [0], [1], [0, 0, 1, 1], [], []>} : vector<16x64xf32>, vector<64x192xf32>, vector<16x192xf32> -> vector<16x192xf32>
    %136 = vector.broadcast %10 : vector<1x192xf32> to vector<16x192xf32>
    %137 = arith.addf %135, %136 : vector<16x192xf32>
    %138 = vector.extract_strided_slice %134 {offsets = [0, 0], sizes = [16, 64], strides = [1, 1]} : vector<16x192xf32> to vector<16x64xf32>
    %139 = vector.extract_strided_slice %137 {offsets = [0, 0], sizes = [16, 64], strides = [1, 1]} : vector<16x192xf32> to vector<16x64xf32>
    %140 = arith.addf %138, %139 : vector<16x64xf32>
    %141 = arith.negf %140 : vector<16x64xf32>
    %142 = math.exp %141 : vector<16x64xf32>
    %cst_37 = arith.constant 1.000000e+00 : f32
    %143 = vector.broadcast %cst_37 : f32 to vector<16x64xf32>
    %144 = arith.addf %143, %142 : vector<16x64xf32>
    %145 = arith.divf %143, %144 : vector<16x64xf32>
    %146 = vector.extract_strided_slice %134 {offsets = [0, 64], sizes = [16, 64], strides = [1, 1]} : vector<16x192xf32> to vector<16x64xf32>
    %147 = vector.extract_strided_slice %137 {offsets = [0, 64], sizes = [16, 64], strides = [1, 1]} : vector<16x192xf32> to vector<16x64xf32>
    %148 = arith.addf %146, %147 : vector<16x64xf32>
    %149 = arith.negf %148 : vector<16x64xf32>
    %150 = math.exp %149 : vector<16x64xf32>
    %cst_38 = arith.constant 1.000000e+00 : f32
    %151 = vector.broadcast %cst_38 : f32 to vector<16x64xf32>
    %152 = arith.addf %151, %150 : vector<16x64xf32>
    %153 = arith.divf %151, %152 : vector<16x64xf32>
    %154 = vector.extract_strided_slice %134 {offsets = [0, 128], sizes = [16, 64], strides = [1, 1]} : vector<16x192xf32> to vector<16x64xf32>
    %155 = vector.extract_strided_slice %137 {offsets = [0, 128], sizes = [16, 64], strides = [1, 1]} : vector<16x192xf32> to vector<16x64xf32>
    %156 = arith.mulf %145, %155 : vector<16x64xf32>
    %157 = arith.addf %154, %156 : vector<16x64xf32>
    %158 = math.tanh %157 : vector<16x64xf32>
    %159 = arith.subf %131, %158 : vector<16x64xf32>
    %160 = arith.mulf %153, %159 : vector<16x64xf32>
    %161 = arith.addf %160, %158 : vector<16x64xf32>
    %c5_i32 = arith.constant 5 : i32
    %162 = arith.index_cast %c5_i32 : i32 to index
    %c0_39 = arith.constant 0 : index
    %c0_40 = arith.constant 0 : index
    %163 = vector.load %arg9[%162, %c0_39, %c0_40] : memref<8x16x192xf32, #tpu.memory_space<vmem>>, vector<1x16x192xf32>
    %164 = vector.shape_cast %163 : vector<1x16x192xf32> to vector<16x192xf32>
    %cst_41 = arith.constant dense<0.000000e+00> : vector<16x192xf32>
    %165 = tpu.matmul %161, %9, %cst_41 {dimension_numbers = #tpu.dot_dimension_numbers<[1], [0], [0], [1], [0, 0, 1, 1], [], []>} : vector<16x64xf32>, vector<64x192xf32>, vector<16x192xf32> -> vector<16x192xf32>
    %166 = vector.broadcast %10 : vector<1x192xf32> to vector<16x192xf32>
    %167 = arith.addf %165, %166 : vector<16x192xf32>
    %168 = vector.extract_strided_slice %164 {offsets = [0, 0], sizes = [16, 64], strides = [1, 1]} : vector<16x192xf32> to vector<16x64xf32>
    %169 = vector.extract_strided_slice %167 {offsets = [0, 0], sizes = [16, 64], strides = [1, 1]} : vector<16x192xf32> to vector<16x64xf32>
    %170 = arith.addf %168, %169 : vector<16x64xf32>
    %171 = arith.negf %170 : vector<16x64xf32>
    %172 = math.exp %171 : vector<16x64xf32>
    %cst_42 = arith.constant 1.000000e+00 : f32
    %173 = vector.broadcast %cst_42 : f32 to vector<16x64xf32>
    %174 = arith.addf %173, %172 : vector<16x64xf32>
    %175 = arith.divf %173, %174 : vector<16x64xf32>
    %176 = vector.extract_strided_slice %164 {offsets = [0, 64], sizes = [16, 64], strides = [1, 1]} : vector<16x192xf32> to vector<16x64xf32>
    %177 = vector.extract_strided_slice %167 {offsets = [0, 64], sizes = [16, 64], strides = [1, 1]} : vector<16x192xf32> to vector<16x64xf32>
    %178 = arith.addf %176, %177 : vector<16x64xf32>
    %179 = arith.negf %178 : vector<16x64xf32>
    %180 = math.exp %179 : vector<16x64xf32>
    %cst_43 = arith.constant 1.000000e+00 : f32
    %181 = vector.broadcast %cst_43 : f32 to vector<16x64xf32>
    %182 = arith.addf %181, %180 : vector<16x64xf32>
    %183 = arith.divf %181, %182 : vector<16x64xf32>
    %184 = vector.extract_strided_slice %164 {offsets = [0, 128], sizes = [16, 64], strides = [1, 1]} : vector<16x192xf32> to vector<16x64xf32>
    %185 = vector.extract_strided_slice %167 {offsets = [0, 128], sizes = [16, 64], strides = [1, 1]} : vector<16x192xf32> to vector<16x64xf32>
    %186 = arith.mulf %175, %185 : vector<16x64xf32>
    %187 = arith.addf %184, %186 : vector<16x64xf32>
    %188 = math.tanh %187 : vector<16x64xf32>
    %189 = arith.subf %161, %188 : vector<16x64xf32>
    %190 = arith.mulf %183, %189 : vector<16x64xf32>
    %191 = arith.addf %190, %188 : vector<16x64xf32>
    %c6_i32 = arith.constant 6 : i32
    %192 = arith.index_cast %c6_i32 : i32 to index
    %c0_44 = arith.constant 0 : index
    %c0_45 = arith.constant 0 : index
    %193 = vector.load %arg9[%192, %c0_44, %c0_45] : memref<8x16x192xf32, #tpu.memory_space<vmem>>, vector<1x16x192xf32>
    %194 = vector.shape_cast %193 : vector<1x16x192xf32> to vector<16x192xf32>
    %cst_46 = arith.constant dense<0.000000e+00> : vector<16x192xf32>
    %195 = tpu.matmul %191, %9, %cst_46 {dimension_numbers = #tpu.dot_dimension_numbers<[1], [0], [0], [1], [0, 0, 1, 1], [], []>} : vector<16x64xf32>, vector<64x192xf32>, vector<16x192xf32> -> vector<16x192xf32>
    %196 = vector.broadcast %10 : vector<1x192xf32> to vector<16x192xf32>
    %197 = arith.addf %195, %196 : vector<16x192xf32>
    %198 = vector.extract_strided_slice %194 {offsets = [0, 0], sizes = [16, 64], strides = [1, 1]} : vector<16x192xf32> to vector<16x64xf32>
    %199 = vector.extract_strided_slice %197 {offsets = [0, 0], sizes = [16, 64], strides = [1, 1]} : vector<16x192xf32> to vector<16x64xf32>
    %200 = arith.addf %198, %199 : vector<16x64xf32>
    %201 = arith.negf %200 : vector<16x64xf32>
    %202 = math.exp %201 : vector<16x64xf32>
    %cst_47 = arith.constant 1.000000e+00 : f32
    %203 = vector.broadcast %cst_47 : f32 to vector<16x64xf32>
    %204 = arith.addf %203, %202 : vector<16x64xf32>
    %205 = arith.divf %203, %204 : vector<16x64xf32>
    %206 = vector.extract_strided_slice %194 {offsets = [0, 64], sizes = [16, 64], strides = [1, 1]} : vector<16x192xf32> to vector<16x64xf32>
    %207 = vector.extract_strided_slice %197 {offsets = [0, 64], sizes = [16, 64], strides = [1, 1]} : vector<16x192xf32> to vector<16x64xf32>
    %208 = arith.addf %206, %207 : vector<16x64xf32>
    %209 = arith.negf %208 : vector<16x64xf32>
    %210 = math.exp %209 : vector<16x64xf32>
    %cst_48 = arith.constant 1.000000e+00 : f32
    %211 = vector.broadcast %cst_48 : f32 to vector<16x64xf32>
    %212 = arith.addf %211, %210 : vector<16x64xf32>
    %213 = arith.divf %211, %212 : vector<16x64xf32>
    %214 = vector.extract_strided_slice %194 {offsets = [0, 128], sizes = [16, 64], strides = [1, 1]} : vector<16x192xf32> to vector<16x64xf32>
    %215 = vector.extract_strided_slice %197 {offsets = [0, 128], sizes = [16, 64], strides = [1, 1]} : vector<16x192xf32> to vector<16x64xf32>
    %216 = arith.mulf %205, %215 : vector<16x64xf32>
    %217 = arith.addf %214, %216 : vector<16x64xf32>
    %218 = math.tanh %217 : vector<16x64xf32>
    %219 = arith.subf %191, %218 : vector<16x64xf32>
    %220 = arith.mulf %213, %219 : vector<16x64xf32>
    %221 = arith.addf %220, %218 : vector<16x64xf32>
    %c7_i32 = arith.constant 7 : i32
    %222 = arith.index_cast %c7_i32 : i32 to index
    %c0_49 = arith.constant 0 : index
    %c0_50 = arith.constant 0 : index
    %223 = vector.load %arg9[%222, %c0_49, %c0_50] : memref<8x16x192xf32, #tpu.memory_space<vmem>>, vector<1x16x192xf32>
    %224 = vector.shape_cast %223 : vector<1x16x192xf32> to vector<16x192xf32>
    %cst_51 = arith.constant dense<0.000000e+00> : vector<16x192xf32>
    %225 = tpu.matmul %221, %9, %cst_51 {dimension_numbers = #tpu.dot_dimension_numbers<[1], [0], [0], [1], [0, 0, 1, 1], [], []>} : vector<16x64xf32>, vector<64x192xf32>, vector<16x192xf32> -> vector<16x192xf32>
    %226 = vector.broadcast %10 : vector<1x192xf32> to vector<16x192xf32>
    %227 = arith.addf %225, %226 : vector<16x192xf32>
    %228 = vector.extract_strided_slice %224 {offsets = [0, 0], sizes = [16, 64], strides = [1, 1]} : vector<16x192xf32> to vector<16x64xf32>
    %229 = vector.extract_strided_slice %227 {offsets = [0, 0], sizes = [16, 64], strides = [1, 1]} : vector<16x192xf32> to vector<16x64xf32>
    %230 = arith.addf %228, %229 : vector<16x64xf32>
    %231 = arith.negf %230 : vector<16x64xf32>
    %232 = math.exp %231 : vector<16x64xf32>
    %cst_52 = arith.constant 1.000000e+00 : f32
    %233 = vector.broadcast %cst_52 : f32 to vector<16x64xf32>
    %234 = arith.addf %233, %232 : vector<16x64xf32>
    %235 = arith.divf %233, %234 : vector<16x64xf32>
    %236 = vector.extract_strided_slice %224 {offsets = [0, 64], sizes = [16, 64], strides = [1, 1]} : vector<16x192xf32> to vector<16x64xf32>
    %237 = vector.extract_strided_slice %227 {offsets = [0, 64], sizes = [16, 64], strides = [1, 1]} : vector<16x192xf32> to vector<16x64xf32>
    %238 = arith.addf %236, %237 : vector<16x64xf32>
    %239 = arith.negf %238 : vector<16x64xf32>
    %240 = math.exp %239 : vector<16x64xf32>
    %cst_53 = arith.constant 1.000000e+00 : f32
    %241 = vector.broadcast %cst_53 : f32 to vector<16x64xf32>
    %242 = arith.addf %241, %240 : vector<16x64xf32>
    %243 = arith.divf %241, %242 : vector<16x64xf32>
    %244 = vector.extract_strided_slice %224 {offsets = [0, 128], sizes = [16, 64], strides = [1, 1]} : vector<16x192xf32> to vector<16x64xf32>
    %245 = vector.extract_strided_slice %227 {offsets = [0, 128], sizes = [16, 64], strides = [1, 1]} : vector<16x192xf32> to vector<16x64xf32>
    %246 = arith.mulf %235, %245 : vector<16x64xf32>
    %247 = arith.addf %244, %246 : vector<16x64xf32>
    %248 = math.tanh %247 : vector<16x64xf32>
    %249 = arith.subf %221, %248 : vector<16x64xf32>
    %250 = arith.mulf %243, %249 : vector<16x64xf32>
    %251 = arith.addf %250, %248 : vector<16x64xf32>
    %c8_i32 = arith.constant 8 : i32
    %c0_54 = arith.constant 0 : index
    %c0_55 = arith.constant 0 : index
    %252 = vector.load %arg6[%c0_54, %c0_55] : memref<64x10xf32, #tpu.memory_space<vmem>>, vector<64x10xf32>
    %cst_56 = arith.constant dense<0.000000e+00> : vector<16x10xf32>
    %253 = tpu.matmul %251, %252, %cst_56 {dimension_numbers = #tpu.dot_dimension_numbers<[1], [0], [0], [1], [0, 0, 1, 1], [], []>} : vector<16x64xf32>, vector<64x10xf32>, vector<16x10xf32> -> vector<16x10xf32>
    %c0_57 = arith.constant 0 : index
    %c0_58 = arith.constant 0 : index
    %254 = vector.load %arg7[%c0_57, %c0_58] : memref<1x10xf32, #tpu.memory_space<vmem>>, vector<1x10xf32>
    %255 = vector.broadcast %254 : vector<1x10xf32> to vector<16x10xf32>
    %256 = arith.addf %253, %255 : vector<16x10xf32>
    %c0_59 = arith.constant 0 : index
    %c0_60 = arith.constant 0 : index
    %257 = vector.load %arg8[%c0_59, %c0_60] : memref<16x10xf32, #tpu.memory_space<vmem>>, vector<16x10xf32>
    tpu.vector_store %arg8[%c0_59, %c0_60], %256 {strides = array<i32>} : memref<16x10xf32, #tpu.memory_space<vmem>>, vector<16x10xf32>,
    return
  }
  func.func @transform_0(%arg0: i32) -> (i32, i32, i32) {
    %c0_i32 = arith.constant 0 : i32
    %c0_i32_0 = arith.constant 0 : i32
    %c0_i32_1 = arith.constant 0 : i32
    return %c0_i32, %arg0, %c0_i32_0 : i32, i32, i32
  }
  func.func @transform_1(%arg0: i32) -> (i32, i32) {
    %c0_i32 = arith.constant 0 : i32
    %c0_i32_0 = arith.constant 0 : i32
    %c0_i32_1 = arith.constant 0 : i32
    return %c0_i32, %c0_i32_0 : i32, i32
  }
  func.func @transform_2(%arg0: i32) -> (i32, i32) {
    %c0_i32 = arith.constant 0 : i32
    %c0_i32_0 = arith.constant 0 : i32
    %c0_i32_1 = arith.constant 0 : i32
    return %c0_i32, %c0_i32_0 : i32, i32
  }
  func.func @transform_3(%arg0: i32) -> (i32, i32) {
    %c0_i32 = arith.constant 0 : i32
    %c0_i32_0 = arith.constant 0 : i32
    %c0_i32_1 = arith.constant 0 : i32
    return %c0_i32, %c0_i32_0 : i32, i32
  }
  func.func @transform_4(%arg0: i32) -> (i32, i32) {
    %c0_i32 = arith.constant 0 : i32
    %c0_i32_0 = arith.constant 0 : i32
    %c0_i32_1 = arith.constant 0 : i32
    return %c0_i32, %c0_i32_0 : i32, i32
  }
  func.func @transform_5(%arg0: i32) -> (i32, i32) {
    %c0_i32 = arith.constant 0 : i32
    %c0_i32_0 = arith.constant 0 : i32
    %c0_i32_1 = arith.constant 0 : i32
    return %c0_i32, %c0_i32_0 : i32, i32
  }
  func.func @transform_6(%arg0: i32) -> (i32, i32) {
    %c0_i32 = arith.constant 0 : i32
    %c0_i32_0 = arith.constant 0 : i32
    %c0_i32_1 = arith.constant 0 : i32
    return %c0_i32, %c0_i32_0 : i32, i32
  }
  func.func @transform_7(%arg0: i32) -> (i32, i32) {
    %c0_i32 = arith.constant 0 : i32
    %c0_i32_0 = arith.constant 0 : i32
    return %arg0, %c0_i32 : i32, i32
  }
}

</mosaic_0001>

<bundles_post_ra>
// kernel: tpu_custom_call.1
= control target key start
LH: loop header
LB: loop body
LE: loop exit
PB: predicated region body
PF: predicated region fallthrough
CT: control target
= control target key end

     0   :  { %s2995_s0 = inlined_call_operand.vmem [shape: bf16[8,16,256], index: 0, kind: input, shape index: {}]   ;;  %s2996_s1 = inlined_call_operand.vmem [shape: bf16[256,192], index: 1, kind: input, shape index: {}]   ;;  %s2997_s2 = inlined_call_operand.vmem [shape: f32[1,192], index: 2, kind: input, shape index: {}]   ;;  %s2998_s3 = inlined_call_operand.vmem [shape: f32[64,192], index: 3, kind: input, shape index: {}]   ;;  %s2999_s4 = inlined_call_operand.vmem [shape: f32[1,192], index: 4, kind: input, shape index: {}]   ;;  %s3000_s5 = inlined_call_operand.vmem [shape: f32[64,10], index: 5, kind: input, shape index: {}]   ;;  %s3001_s6 = inlined_call_operand.vmem [shape: f32[1,10], index: 6, kind: input, shape index: {}]   ;;  %s3002_s7 = inlined_call_operand.hbm [shape: f32[16,10], index: 7, kind: output, shape index: {}]  }
   0x1   :  { %v1728_v0 = vld [vmem:[%s2996_s1 + $0x70] sm:$0xf]  ;;  %v1875_v1 = vld [vmem:[%s2996_s1 + $0x74] sm:$0xf0]  ;;  %v1720_v5 = vld [vmem:[%s2996_s1 + $0x60] sm:$0xf] }
   0x2   :  { %v1792_v2 = vld [vmem:[%s2996_s1 + $0xf0] sm:$0xf]  ;;  %v1729_v3 = vor.u32 %v1875_v1, %v1728_v0  ;;  %v1891_v4 = vld [vmem:[%s2996_s1 + $0xf4] sm:$0xf0]  ;;  %v1873_v6 = vld [vmem:[%s2996_s1 + $0x64] sm:$0xf0] }
   0x3   :  { %v1793_v7 = vor.u32 %v1891_v4, %v1792_v2  ;;  %v1784_v8 = vld [vmem:[%s2996_s1 + $0xe0] sm:$0xf]  ;;  %v1889_v9 = vld [vmem:[%s2996_s1 + $0xe4] sm:$0xf0]  ;;  %v1721_v10 = vor.u32 %v1873_v6, %v1720_v5  ;;  %v1712_v12 = vld [vmem:[%s2996_s1 + $0x50] sm:$0xf] }
   0x4   :  { %321 = vmatpush.bf16.msra.mxu0 %v1729_v3  ;;  %v1785_v11 = vor.u32 %v1889_v9, %v1784_v8  ;;  %v1871_v13 = vld [vmem:[%s2996_s1 + $0x54] sm:$0xf0]  ;;  %v1776_v14 = vld [vmem:[%s2996_s1 + $0xd0] sm:$0xf]  ;;  %v1704_v18 = vld [vmem:[%s2996_s1 + $0x40] sm:$0xf] }
   0x5   :  { %370 = vmatpush.bf16.msra.mxu1 %v1793_v7  ;;  %v1887_v15 = vld [vmem:[%s2996_s1 + $0xd4] sm:$0xf0]  ;;  %v1713_v16 = vor.u32 %v1871_v13, %v1712_v12  ;;  %v1869_v19 = vld [vmem:[%s2996_s1 + $0x44] sm:$0xf0]  ;;  %v1768_v20 = vld [vmem:[%s2996_s1 + $0xc0] sm:$0xf] }
   0x6   :  { %v1777_v17 = vor.u32 %v1887_v15, %v1776_v14  ;;  %v1885_v21 = vld [vmem:[%s2996_s1 + $0xc4] sm:$0xf0]  ;;  %v1705_v22 = vor.u32 %v1869_v19, %v1704_v18  ;;  %v1696_v24 = vld [vmem:[%s2996_s1 + $0x30] sm:$0xf]  ;;  %v1867_v25 = vld [vmem:[%s2996_s1 + $0x34] sm:$0xf0] }
   0x7   :  { %v1769_v23 = vor.u32 %v1885_v21, %v1768_v20  ;;  %v1760_v26 = vld [vmem:[%s2996_s1 + $0xb0] sm:$0xf]  ;;  %v1883_v27 = vld [vmem:[%s2996_s1 + $0xb4] sm:$0xf0] }
   0x8   :  { %322 = vmatpush.bf16.msra.mxu0 %v1721_v10 }
   0x9   :  { %371 = vmatpush.bf16.msra.mxu1 %v1785_v11 }
   0xc   :  { %323 = vmatpush.bf16.msra.mxu0 %v1713_v16 }
   0xd   :  { %372 = vmatpush.bf16.msra.mxu1 %v1777_v17 }
   0xe   :  { %12 = vsyncpa [#allocation4], 0  ;;  %v1697_v28 = vor.u32 %v1867_v25, %v1696_v24  ;;  %v1761_v29 = vor.u32 %v1883_v27, %v1760_v26  ;;  %v1688_v30 = vld [vmem:[%s2996_s1 + $0x20] sm:$0xf]  ;;  %v1865_v31 = vld [vmem:[%s2996_s1 + $0x24] sm:$0xf0] }
   0xf   :  { %v1752_v32 = vld [vmem:[%s2996_s1 + $0xa0] sm:$0xf]  ;;  %v1881_v33 = vld [vmem:[%s2996_s1 + $0xa4] sm:$0xf0]  ;;  %v1689_v34 = vor.u32 %v1865_v31, %v1688_v30  ;;  %v1680_v36 = vld [vmem:[%s2996_s1 + $0x10] sm:$0xf] }
  0x10   :  { %324 = vmatpush.bf16.msra.mxu0 %v1705_v22  ;;  %v1753_v35 = vor.u32 %v1881_v33, %v1752_v32  ;;  %v1863_v37 = vld [vmem:[%s2996_s1 + $0x14] sm:$0xf0]  ;;  %v1744_v38 = vld [vmem:[%s2996_s1 + $0x90] sm:$0xf]  ;;  %v1672_v42 = vld [vmem:[%s2996_s1] sm:$0xf] }
  0x11   :  { %373 = vmatpush.bf16.msra.mxu1 %v1769_v23  ;;  %v1879_v39 = vld [vmem:[%s2996_s1 + $0x94] sm:$0xf0]  ;;  %v1681_v40 = vor.u32 %v1863_v37, %v1680_v36  ;;  %v1861_v43 = vld [vmem:[%s2996_s1 + $0x4] sm:$0xf0]  ;;  %v1736_v44 = vld [vmem:[%s2996_s1 + $0x80] sm:$0xf] }
  0x12   :  { %v1745_v41 = vor.u32 %v1879_v39, %v1744_v38  ;;  %v1877_v45 = vld [vmem:[%s2996_s1 + $0x84] sm:$0xf0]  ;;  %v1673_v46 = vor.u32 %v1861_v43, %v1672_v42  ;;  %v1608_v47 = vld [vmem:[%s2995_s0] sm:$0xf]  ;;  %v1844_v50 = vld [vmem:[%s2995_s0 + $0x4] sm:$0xf] }
  0x13   :  { %v1845_v48 = vld [vmem:[%s2995_s0 + $0x4] sm:$0xf0]  ;;  %v1737_v49 = vor.u32 %v1877_v45, %v1736_v44  ;;  %v1610_v51 = vld [vmem:[%s2995_s0 + $0x8] sm:$0xf0]  ;;  %v2200_v52 = vld [vmem:[%s2998_s3 + $0x70] sm:$0xff]  ;;  %vm518_vm0 = vcmask 523264  }
  0x14   :  { %325 = vmatpush.bf16.msra.mxu0 %v1697_v28  ;;  %v2202_v53 = vor.u32 %v1845_v48, %v1608_v47  ;;  %v2207_v54 = vld [vmem:[%s2998_s3 + $0x78] sm:$0xff]  ;;  %v2209_v55 = vor.u32 %v1844_v50, %v1610_v51  ;;  %v2215_v56 = vld [vmem:[%s2998_s3 + $0x60] sm:$0xff]  ;;  %v2222_v57 = vld [vmem:[%s2998_s3 + $0x50] sm:$0xff]  ;;  %s2047_s19 = smov 128   ;;  %s2048_s20 = smov 8  }
  0x15   :  { %374 = vmatpush.bf16.msra.mxu1 %v1761_v29  ;;  %v2229_v58 = vld [vmem:[%s2998_s3 + $0x68] sm:$0xff]  ;;  %v1616_v59 = vld [vmem:[%s2995_s0 + $0x10] sm:$0xf]  ;;  %v1847_v60 = vld [vmem:[%s2995_s0 + $0x14] sm:$0xf0] }
  0x16   :  { %v1846_v61 = vld [vmem:[%s2995_s0 + $0x14] sm:$0xf]  ;;  %v1618_v62 = vld [vmem:[%s2995_s0 + $0x18] sm:$0xf0]  ;;  %v2245_v63 = vor.u32 %v1847_v60, %v1616_v59  ;;  %v2253_v1 = vld [vmem:[%s2998_s3 + $0x40] sm:$0xff] }
  0x17   :  { %v2247_v0 = vor.u32 %v1846_v61, %v1618_v62  ;;  %v2260_v2 = vld [vmem:[%s2998_s3 + $0x58] sm:$0xff]  ;;  %v1624_v3 = vld [vmem:[%s2995_s0 + $0x20] sm:$0xf]  ;;  %v1849_v4 = vld [vmem:[%s2995_s0 + $0x24] sm:$0xf0] }
  0x18   :  { %326 = vmatpush.bf16.msra.mxu0 %v1689_v34  ;;  %v1848_v5 = vld [vmem:[%s2995_s0 + $0x24] sm:$0xf]  ;;  %v1626_v6 = vld [vmem:[%s2995_s0 + $0x28] sm:$0xf0]  ;;  %v2275_v7 = vor.u32 %v1849_v4, %v1624_v3  ;;  %v2283_v9 = vld [vmem:[%s2998_s3 + $0x30] sm:$0xff] }
  0x19   :  { %375 = vmatpush.bf16.msra.mxu1 %v1753_v35  ;;  %v2277_v8 = vor.u32 %v1848_v5, %v1626_v6  ;;  %v2290_v10 = vld [vmem:[%s2998_s3 + $0x48] sm:$0xff]  ;;  %v1632_v11 = vld [vmem:[%s2995_s0 + $0x30] sm:$0xf]  ;;  %v1851_v12 = vld [vmem:[%s2995_s0 + $0x34] sm:$0xf0] }
  0x1a   :  { %v1850_v13 = vld [vmem:[%s2995_s0 + $0x34] sm:$0xf]  ;;  %v1634_v14 = vld [vmem:[%s2995_s0 + $0x38] sm:$0xf0]  ;;  %v2305_v15 = vor.u32 %v1851_v12, %v1632_v11  ;;  %v2313_v17 = vld [vmem:[%s2998_s3 + $0x20] sm:$0xff] }
  0x1b   :  { %v2307_v16 = vor.u32 %v1850_v13, %v1634_v14  ;;  %v2320_v18 = vld [vmem:[%s2998_s3 + $0x38] sm:$0xff]  ;;  %v1640_v19 = vld [vmem:[%s2995_s0 + $0x40] sm:$0xf]  ;;  %v1853_v20 = vld [vmem:[%s2995_s0 + $0x44] sm:$0xf0] }
  0x1c   :  { %327 = vmatpush.bf16.msra.mxu0 %v1681_v40  ;;  %v1852_v21 = vld [vmem:[%s2995_s0 + $0x44] sm:$0xf]  ;;  %v1642_v22 = vld [vmem:[%s2995_s0 + $0x48] sm:$0xf0]  ;;  %v2335_v23 = vor.u32 %v1853_v20, %v1640_v19  ;;  %v2343_v25 = vld [vmem:[%s2998_s3 + $0x10] sm:$0xff] }
  0x1d   :  { %376 = vmatpush.bf16.msra.mxu1 %v1745_v41  ;;  %v2337_v24 = vor.u32 %v1852_v21, %v1642_v22  ;;  %v1874_v26 = vld [vmem:[%s2996_s1 + $0x74] sm:$0xf]  ;;  %v1730_v27 = vld [vmem:[%s2996_s1 + $0x78] sm:$0xf0]  ;;  %v1872_v31 = vld [vmem:[%s2996_s1 + $0x64] sm:$0xf] }
  0x1e   :  { %v1890_v28 = vld [vmem:[%s2996_s1 + $0xf4] sm:$0xf]  ;;  %v1733_v29 = vor.u32 %v1874_v26, %v1730_v27  ;;  %v1794_v30 = vld [vmem:[%s2996_s1 + $0xf8] sm:$0xf0]  ;;  %v1722_v32 = vld [vmem:[%s2996_s1 + $0x68] sm:$0xf0] }
  0x1f   :  { %v1797_v33 = vor.u32 %v1890_v28, %v1794_v30  ;;  %v2368_v34 = vld [vmem:[%s2998_s3 + $0x28] sm:$0xff]  ;;  %v1888_v35 = vld [vmem:[%s2996_s1 + $0xe4] sm:$0xf]  ;;  %v1725_v37 = vor.u32 %v1872_v31, %v1722_v32  ;;  %v1648_v39 = vld [vmem:[%s2995_s0 + $0x50] sm:$0xf] }
  0x20   :  { %328 = vmatpush.bf16.msra.mxu0 %v1673_v46  ;;  %v1786_v36 = vld [vmem:[%s2996_s1 + $0xe8] sm:$0xf0]  ;;  %419 = vmatpush.bf16.msra.mxu2 %v1733_v29  ;;  %v1855_v40 = vld [vmem:[%s2995_s0 + $0x54] sm:$0xf0]  ;;  %v1854_v41 = vld [vmem:[%s2995_s0 + $0x54] sm:$0xf] }
  0x21   :  { %377 = vmatpush.bf16.msra.mxu1 %v1737_v49  ;;  %468 = vmatpush.bf16.msra.mxu3 %v1797_v33  ;;  %v1789_v38 = vor.u32 %v1888_v35, %v1786_v36  ;;  %v1650_v42 = vld [vmem:[%s2995_s0 + $0x58] sm:$0xf0]  ;;  %v2389_v43 = vor.u32 %v1855_v40, %v1648_v39  ;;  %v1870_v45 = vld [vmem:[%s2996_s1 + $0x54] sm:$0xf]  ;;  %v2403_v48 = vld [vmem:[%s2998_s3] sm:$0xff] }
  0x22   :  { %v2391_v44 = vor.u32 %v1854_v41, %v1650_v42  ;;  %v1714_v46 = vld [vmem:[%s2996_s1 + $0x58] sm:$0xf0]  ;;  %v1886_v49 = vld [vmem:[%s2996_s1 + $0xd4] sm:$0xf]  ;;  %v1868_v59 = vld [vmem:[%s2996_s1 + $0x44] sm:$0xf] }
  0x23   :  { %329 = vmatmul.bf16.vlgmr.msra.gmra.mxu0 %v2202_v53  ;;  %v1717_v47 = vor.u32 %v1870_v45, %v1714_v46  ;;  %v1778_v50 = vld [vmem:[%s2996_s1 + $0xd8] sm:$0xf0]  ;;  %v1706_v60 = vld [vmem:[%s2996_s1 + $0x48] sm:$0xf0]  ;;  %v1884_v61 = vld [vmem:[%s2996_s1 + $0xc4] sm:$0xf] }
  0x24   :  { %587 = vmatpush.msrb.mxu0 %v2200_v52  ;;  %378 = vmatmul.bf16.vlgmr.msra.gmra.mxu1 %v2209_v55  ;;  %v1781_v51 = vor.u32 %v1886_v49, %v1778_v50  ;;  %v1709_v62 = vor.u32 %v1868_v59, %v1706_v60  ;;  %v1770_v3 = vld [vmem:[%s2996_s1 + $0xc8] sm:$0xf0]  ;;  %v1866_v5 = vld [vmem:[%s2996_s1 + $0x34] sm:$0xf]  ;;  %v1698_v6 = vld [vmem:[%s2996_s1 + $0x38] sm:$0xf0] }
  0x25   :  { %610 = vmatpush.msrb.mxu1 %v2207_v54  ;;  %420 = vmatpush.bf16.msra.mxu2 %v1725_v37  ;;  %v1773_v4 = vor.u32 %v1884_v61, %v1770_v3  ;;  %v1882_v11 = vld [vmem:[%s2996_s1 + $0xb4] sm:$0xf]  ;;  %v1762_v12 = vld [vmem:[%s2996_s1 + $0xb8] sm:$0xf0]  ;;  %v1701_v13 = vor.u32 %v1866_v5, %v1698_v6  ;;  %v1656_v19 = vld [vmem:[%s2995_s0 + $0x60] sm:$0xf] }
  0x26   :  { %588 = vmatpush.msrb.mxu0 %v2215_v56  ;;  %469 = vmatpush.bf16.msra.mxu3 %v1789_v38  ;;  %v1765_v14 = vor.u32 %v1882_v11, %v1762_v12  ;;  %v1857_v20 = vld [vmem:[%s2995_s0 + $0x64] sm:$0xf0]  ;;  %v1856_v21 = vld [vmem:[%s2995_s0 + $0x64] sm:$0xf]  ;;  %v1658_v22 = vld [vmem:[%s2995_s0 + $0x68] sm:$0xf0] }
  0x27   :  { %611 = vmatpush.msrb.mxu1 %v2229_v58  ;;  %v1864_v26 = vld [vmem:[%s2996_s1 + $0x24] sm:$0xf]  ;;  %v1690_v27 = vld [vmem:[%s2996_s1 + $0x28] sm:$0xf0]  ;;  %v2460_v29 = vor.u32 %v1857_v20, %v1656_v19  ;;  %v2469_v32 = vor.u32 %v1856_v21, %v1658_v22  ;;  %v2474_v35 = vld [vmem:[%s2998_s3 + $0x18] sm:$0xff]  ;;  %v2044_v11 = vmov 0.0  }
  0x28   :  { %589 = vmatpush.msrb.mxu0 %v2222_v57  ;;  %v1693_v28 = vor.u32 %v1864_v26, %v1690_v27  ;;  %v1880_v30 = vld [vmem:[%s2996_s1 + $0xa4] sm:$0xf]  ;;  %v1754_v31 = vld [vmem:[%s2996_s1 + $0xa8] sm:$0xf0]  ;;  %v1862_v36 = vld [vmem:[%s2996_s1 + $0x14] sm:$0xf] }
  0x29   :  { %612 = vmatpush.msrb.mxu1 %v2260_v2  ;;  %421 = vmatpush.bf16.msra.mxu2 %v1717_v47  ;;  %v1757_v33 = vor.u32 %v1880_v30, %v1754_v31  ;;  %v1682_v37 = vld [vmem:[%s2996_s1 + $0x18] sm:$0xf0]  ;;  %v1878_v39 = vld [vmem:[%s2996_s1 + $0x94] sm:$0xf]  ;;  %v1860_v42 = vld [vmem:[%s2996_s1 + $0x4] sm:$0xf] }
  0x2a   :  { %590 = vmatpush.msrb.mxu0 %v2253_v1  ;;  %470 = vmatpush.bf16.msra.mxu3 %v1781_v51  ;;  %v1685_v38 = vor.u32 %v1862_v36, %v1682_v37  ;;  %v1746_v40 = vld [vmem:[%s2996_s1 + $0x98] sm:$0xf0]  ;;  %v1674_v45 = vld [vmem:[%s2996_s1 + $0x8] sm:$0xf0]  ;;  %v1876_v47 = vld [vmem:[%s2996_s1 + $0x84] sm:$0xf] }
  0x2b   :  { %613 = vmatpush.msrb.mxu1 %v2290_v10  ;;  %v1749_v41 = vor.u32 %v1878_v39, %v1746_v40  ;;  %v1677_v46 = vor.u32 %v1860_v42, %v1674_v45  ;;  %v1738_v49 = vld [vmem:[%s2996_s1 + $0x88] sm:$0xf0]  ;;  %v1664_v51 = vld [vmem:[%s2995_s0 + $0x70] sm:$0xf]  ;;  %v1859_v59 = vld [vmem:[%s2995_s0 + $0x74] sm:$0xf0] }
  0x2c   :  { %591 = vmatpush.msrb.mxu0 %v2283_v9  ;;  %v1741_v50 = vor.u32 %v1876_v47, %v1738_v49  ;;  %v1858_v60 = vld [vmem:[%s2995_s0 + $0x74] sm:$0xf]  ;;  %v1666_v61 = vld [vmem:[%s2995_s0 + $0x78] sm:$0xf0]  ;;  %s2046_s0 = smov [#allocation3]  }
  0x2d   :  { %614 = vmatpush.msrb.mxu1 %v2320_v18  ;;  %422 = vmatpush.bf16.msra.mxu2 %v1709_v62  ;;  %v2523_v62 = vor.u32 %v1859_v59, %v1664_v51  ;;  %v2526_v3 = vor.u32 %v1858_v60, %v1666_v61  ;;  %s1592_s17 = sshll.u32 %s2046_s0, 4  ;;  %s1593_s17 = int_to_ptr.vmem [resolvable:$true] %s1592_s17 }
  0x2e   :  { %592 = vmatpush.msrb.mxu0 %v2313_v17  ;;  %471 = vmatpush.bf16.msra.mxu3 %v1773_v4 }
  0x2f   :  { %615 = vmatpush.msrb.mxu1 %v2368_v34 }
  0x30   :  { %593 = vmatpush.msrb.mxu0 %v2343_v25 }
  0x31   :  { %423 = vmatpush.bf16.msra.mxu2 %v1701_v13  ;;  %616 = vmatpush.msrb.mxu1 %v2474_v35 }
  0x32   :  { %594 = vmatpush.msrb.mxu0 %v2403_v48  ;;  %472 = vmatpush.bf16.msra.mxu3 %v1765_v14 }
  0x33   :  { %334 = vmatmul.bf16.gmra.mxu0 %v2245_v63 }
  0x34   :  { %383 = vmatmul.bf16.gmra.mxu1 %v2247_v0  ;;  %837 = vmatpush.msra.mxu0 %v2200_v52 }
  0x35   :  { %424 = vmatpush.bf16.msra.mxu2 %v1693_v28 }
  0x36   :  { %838 = vmatpush.msra.mxu0 %v2215_v56  ;;  %473 = vmatpush.bf16.msra.mxu3 %v1757_v33 }
  0x38   :  { %839 = vmatpush.msra.mxu0 %v2222_v57 }
  0x39   :  { %425 = vmatpush.bf16.msra.mxu2 %v1685_v38 }
  0x3a   :  { %840 = vmatpush.msra.mxu0 %v2253_v1  ;;  %474 = vmatpush.bf16.msra.mxu3 %v1749_v41 }
  0x3c   :  { %841 = vmatpush.msra.mxu0 %v2283_v9 }
  0x3d   :  { %426 = vmatpush.bf16.msra.mxu2 %v1677_v46 }
  0x3e   :  { %842 = vmatpush.msra.mxu0 %v2313_v17  ;;  %475 = vmatpush.bf16.msra.mxu3 %v1741_v50 }
  0x40   :  { %843 = vmatpush.msra.mxu0 %v2343_v25  ;;  %427 = vmatmul.bf16.vlgmr.msra.gmra.mxu2 %v2202_v53  ;;  %v2532_v53 = vld [vmem:[%s2998_s3 + $0x8] sm:$0xff] }
  0x41   :  { %716 = vmatpush.msrb.mxu2 %v2200_v52  ;;  %476 = vmatmul.bf16.vlgmr.msra.gmra.mxu3 %v2209_v55  ;;  %v2552_v55 = vld [vmem:[%s2997_s2] sm:$0x3] }
  0x42   :  { %844 = vmatpush.msra.mxu0 %v2403_v48  ;;  %739 = vmatpush.msrb.mxu3 %v2207_v54  ;;  %v2560_v4 = vperm.slane %v2552_v55, 0 }
  0x43   :  { %339 = vmatmul.bf16.gmra.mxu0 %v2275_v7  ;;  %717 = vmatpush.msrb.mxu2 %v2215_v56 }
  0x44   :  { %388 = vmatmul.bf16.gmra.mxu1 %v2277_v8  ;;  %740 = vmatpush.msrb.mxu3 %v2229_v58 }
  0x45   :  { %718 = vmatpush.msrb.mxu2 %v2222_v57  ;;  %617 = vmatpush.msrb.mxu1 %v2532_v53 }
  0x46   :  { %741 = vmatpush.msrb.mxu3 %v2260_v2 }
  0x47   :  { %719 = vmatpush.msrb.mxu2 %v2253_v1  ;;  %860 = vmatpush.msra.mxu1 %v2207_v54 }
  0x48   :  { %742 = vmatpush.msrb.mxu3 %v2290_v10 }
  0x49   :  { %720 = vmatpush.msrb.mxu2 %v2283_v9  ;;  %861 = vmatpush.msra.mxu1 %v2229_v58 }
  0x4a   :  { %743 = vmatpush.msrb.mxu3 %v2320_v18 }
  0x4b   :  { %721 = vmatpush.msrb.mxu2 %v2313_v17  ;;  %862 = vmatpush.msra.mxu1 %v2260_v2 }
  0x4c   :  { %744 = vmatpush.msrb.mxu3 %v2368_v34 }
  0x4d   :  { %722 = vmatpush.msrb.mxu2 %v2343_v25  ;;  %863 = vmatpush.msra.mxu1 %v2290_v10 }
  0x4e   :  { %745 = vmatpush.msrb.mxu3 %v2474_v35 }
  0x4f   :  { %723 = vmatpush.msrb.mxu2 %v2403_v48  ;;  %864 = vmatpush.msra.mxu1 %v2320_v18 }
  0x50   :  { %746 = vmatpush.msrb.mxu3 %v2532_v53  ;;  %432 = vmatmul.bf16.gmra.mxu2 %v2245_v63 }
  0x51   :  { %958 = vmatpush.msra.mxu2 %v2200_v52  ;;  %481 = vmatmul.bf16.gmra.mxu3 %v2247_v0 }
  0x52   :  { %981 = vmatpush.msra.mxu3 %v2207_v54  ;;  %865 = vmatpush.msra.mxu1 %v2368_v34 }
  0x53   :  { %344 = vmatmul.bf16.gmra.mxu0 %v2305_v15  ;;  %959 = vmatpush.msra.mxu2 %v2215_v56 }
  0x54   :  { %393 = vmatmul.bf16.gmra.mxu1 %v2307_v16  ;;  %982 = vmatpush.msra.mxu3 %v2229_v58 }
  0x55   :  { %960 = vmatpush.msra.mxu2 %v2222_v57  ;;  %866 = vmatpush.msra.mxu1 %v2474_v35 }
  0x56   :  { %983 = vmatpush.msra.mxu3 %v2260_v2 }
  0x57   :  { %961 = vmatpush.msra.mxu2 %v2253_v1  ;;  %867 = vmatpush.msra.mxu1 %v2532_v53 }
  0x58   :  { %984 = vmatpush.msra.mxu3 %v2290_v10 }
  0x59   :  { %962 = vmatpush.msra.mxu2 %v2283_v9 }
  0x5a   :  { %985 = vmatpush.msra.mxu3 %v2320_v18 }
  0x5b   :  { %963 = vmatpush.msra.mxu2 %v2313_v17 }
  0x5c   :  { %986 = vmatpush.msra.mxu3 %v2368_v34 }
  0x5d   :  { %964 = vmatpush.msra.mxu2 %v2343_v25 }
  0x5e   :  { %987 = vmatpush.msra.mxu3 %v2474_v35 }
  0x5f   :  { %965 = vmatpush.msra.mxu2 %v2403_v48 }
  0x60   :  { %988 = vmatpush.msra.mxu3 %v2532_v53  ;;  %437 = vmatmul.bf16.gmra.mxu2 %v2275_v7 }
  0x61   :  { %486 = vmatmul.bf16.gmra.mxu3 %v2277_v8 }
  0x63   :  { %349 = vmatmul.bf16.gmra.mxu0 %v2335_v23 }
  0x64   :  { %398 = vmatmul.bf16.gmra.mxu1 %v2337_v24 }
  0x70   :  { %442 = vmatmul.bf16.gmra.mxu2 %v2305_v15 }
  0x71   :  { %491 = vmatmul.bf16.gmra.mxu3 %v2307_v16 }
  0x73   :  { %354 = vmatmul.bf16.gmra.mxu0 %v2389_v43 }
  0x74   :  { %403 = vmatmul.bf16.gmra.mxu1 %v2391_v44 }
  0x80   :  { %447 = vmatmul.bf16.gmra.mxu2 %v2335_v23 }
  0x81   :  { %496 = vmatmul.bf16.gmra.mxu3 %v2337_v24 }
  0x83   :  { %359 = vmatmul.bf16.gmra.mxu0 %v2460_v29 }
  0x84   :  { %408 = vmatmul.bf16.gmra.mxu1 %v2469_v32 }
  0x90   :  { %452 = vmatmul.bf16.gmra.mxu2 %v2389_v43 }
  0x91   :  { %501 = vmatmul.bf16.gmra.mxu3 %v2391_v44 }
  0x93   :  { %364 = vmatmul.bf16.gmra.mxu0 %v2523_v62 }
  0x94   :  { %413 = vmatmul.bf16.gmra.mxu1 %v2526_v3 }
  0xa0   :  { %v330_v5 = vpop.f32.mrf.mxu0  ;;  %457 = vmatmul.bf16.gmra.mxu2 %v2460_v29 }
  0xa1   :  { %v331_v63 = vadd.f32 %v330_v5, %v2560_v4  ;;  %v379_v6 = vpop.f32.mrf.mxu1  ;;  %506 = vmatmul.bf16.gmra.mxu3 %v2469_v32 }
  0xa3   :  { %v2573_v0 = vadd.f32 %v379_v6, %v331_v63  ;;  %595 = vmatmul.f32.vlgmr.msrb.gmra.mxu0 %v2044_v11 }
  0xa4   :  { %618 = vmatmul.f32.vlgmr.msrb.gmra.mxu1 %v2044_v11  ;;  %1079 = vmatpush.msrb.mxu0 %v2200_v52 }
  0xa5   :  { %1102 = vmatpush.msrb.mxu1 %v2207_v54 }
  0xa6   :  { %1080 = vmatpush.msrb.mxu0 %v2215_v56 }
  0xa7   :  { %1103 = vmatpush.msrb.mxu1 %v2229_v58 }
  0xa8   :  { %v332_v12 = vpop.f32.mrf.mxu0  ;;  %1081 = vmatpush.msrb.mxu0 %v2222_v57 }
  0xa9   :  { %v333_v13 = vadd.f32 %v332_v12, %v2560_v4  ;;  %v381_v14 = vpop.f32.mrf.mxu1  ;;  %1104 = vmatpush.msrb.mxu1 %v2260_v2 }
  0xaa   :  { %1082 = vmatpush.msrb.mxu0 %v2253_v1 }
  0xab   :  { %v2590_v19 = vadd.f32 %v381_v14, %v333_v13  ;;  %598 = vmatmul.f32.gmra.mxu0 %v2044_v11  ;;  %1105 = vmatpush.msrb.mxu1 %v2290_v10 }
  0xac   :  { %621 = vmatmul.f32.gmra.mxu1 %v2044_v11  ;;  %1083 = vmatpush.msrb.mxu0 %v2283_v9 }
  0xad   :  { %1106 = vmatpush.msrb.mxu1 %v2320_v18 }
  0xae   :  { %1084 = vmatpush.msrb.mxu0 %v2313_v17 }
  0xaf   :  { %1107 = vmatpush.msrb.mxu1 %v2368_v34 }
  0xb0   :  { %v335_v20 = vpop.f32.mrf.mxu0  ;;  %1085 = vmatpush.msrb.mxu0 %v2343_v25  ;;  %462 = vmatmul.bf16.gmra.mxu2 %v2523_v62 }
  0xb1   :  { %v336_v21 = vadd.f32 %v335_v20, %v2560_v4  ;;  %v384_v22 = vpop.f32.mrf.mxu1  ;;  %1108 = vmatpush.msrb.mxu1 %v2474_v35  ;;  %511 = vmatmul.bf16.gmra.mxu3 %v2526_v3  ;;  %v2643_v3 = vperm.slane %v2552_v55, 1 }
  0xb2   :  { %1086 = vmatpush.msrb.mxu0 %v2403_v48 }
  0xb3   :  { %v2602_v26 = vadd.f32 %v384_v22, %v336_v21  ;;  %1109 = vmatpush.msrb.mxu1 %v2532_v53 }
  0xb8   :  { %v337_v7 = vpop.f32.mrf.mxu0 }
  0xb9   :  { %v338_v8 = vadd.f32 %v337_v7, %v2560_v4  ;;  %v386_v27 = vpop.f32.mrf.mxu1 }
  0xbb   :  { %v2609_v28 = vadd.f32 %v386_v27, %v338_v8 }
  0xc0   :  { %v340_v30 = vpop.f32.mrf.mxu0 }
  0xc1   :  { %v341_v31 = vadd.f32 %v340_v30, %v2560_v4  ;;  %v389_v33 = vpop.f32.mrf.mxu1 }
  0xc3   :  { %v2614_v36 = vadd.f32 %v389_v33, %v341_v31  ;;  %v428_v30 = vpop.f32.mrf.mxu2 }
  0xc4   :  { %v477_v33 = vpop.f32.mrf.mxu3 }
  0xc8   :  { %v342_v37 = vpop.f32.mrf.mxu0 }
  0xc9   :  { %v343_v38 = vadd.f32 %v342_v37, %v2560_v4  ;;  %v391_v39 = vpop.f32.mrf.mxu1 }
  0xcb   :  { %v2617_v40 = vadd.f32 %v391_v39, %v343_v38  ;;  %v429_v39 = vadd.f32 %v428_v30, %v2643_v3 }
  0xd0   :  { %v345_v41 = vpop.f32.mrf.mxu0 }
  0xd1   :  { %v346_v15 = vadd.f32 %v345_v41, %v2560_v4  ;;  %v394_v16 = vpop.f32.mrf.mxu1  ;;  %v430_v41 = vpop.f32.mrf.mxu2 }
  0xd3   :  { %v2622_v42 = vadd.f32 %v394_v16, %v346_v15  ;;  %v431_v16 = vadd.f32 %v430_v41, %v2643_v3 }
  0xd8   :  { %v347_v45 = vpop.f32.mrf.mxu0 }
  0xd9   :  { %v348_v46 = vadd.f32 %v347_v45, %v2560_v4  ;;  %v396_v47 = vpop.f32.mrf.mxu1  ;;  %v479_v45 = vpop.f32.mrf.mxu3 }
  0xdb   :  { %v2625_v49 = vadd.f32 %v396_v47, %v348_v46 }
  0xe0   :  { %v350_v50 = vpop.f32.mrf.mxu0 }
  0xe1   :  { %v351_v23 = vadd.f32 %v350_v50, %v2560_v4  ;;  %v399_v24 = vpop.f32.mrf.mxu1  ;;  %v478_v50 = vadd.f32 %v477_v33, %v429_v39 }
  0xe3   :  { %v2630_v51 = vadd.f32 %v399_v24, %v351_v23  ;;  %v566_v23 = vld [vmem:[%s2999_s4] sm:$0x3]  ;;  %v480_v24 = vadd.f32 %v479_v45, %v431_v16  ;;  %519 = vst.msk [vmem:[#allocation2 + $0x8] sm:$0xff] %vm518_vm0, %v478_v50  ;;  %s2045_s4 = smov 64  }
  0xe4   :  { %v2653_v55 = vperm.slane %v566_v23, 0 }
  0xe5   :  { %521 = vst.msk [vmem:[#allocation2 + $0x18] sm:$0xff] %vm518_vm0, %v480_v24 }
  0xe8   :  { %v352_v59 = vpop.f32.mrf.mxu0 }
  0xe9   :  { %v353_v60 = vadd.f32 %v352_v59, %v2560_v4  ;;  %v401_v61 = vpop.f32.mrf.mxu1 }
  0xeb   :  { %v402_v5 = vadd.f32 %v401_v61, %v353_v60 }
  0xed   :  { %536 = vst [vmem:[#allocation2 + $0x90] sm:$0xff] %v402_v5 }
  0xf0   :  { %v355_v63 = vpop.f32.mrf.mxu0 }
  0xf1   :  { %v356_v43 = vadd.f32 %v355_v63, %v2560_v4  ;;  %v404_v44 = vpop.f32.mrf.mxu1 }
  0xf3   :  { %v405_v6 = vadd.f32 %v404_v44, %v356_v43 }
  0xf5   :  { %538 = vst [vmem:[#allocation2 + $0xa0] sm:$0xff] %v405_v6 }
  0xf8   :  { %v357_v11 = vpop.f32.mrf.mxu0 }
  0xf9   :  { %v358_v12 = vadd.f32 %v357_v11, %v2560_v4  ;;  %v406_v13 = vpop.f32.mrf.mxu1 }
  0xfb   :  { %v407_v14 = vadd.f32 %v406_v13, %v358_v12 }
  0xfd   :  { %540 = vst [vmem:[#allocation2 + $0xb0] sm:$0xff] %v407_v14 }
 0x100   :  { %v360_v29 = vpop.f32.mrf.mxu0 }
 0x101   :  { %v361_v20 = vadd.f32 %v360_v29, %v2560_v4  ;;  %v409_v32 = vpop.f32.mrf.mxu1 }
 0x103   :  { %v410_v21 = vadd.f32 %v409_v32, %v361_v20 }
 0x105   :  { %542 = vst [vmem:[#allocation2 + $0xc0] sm:$0xff] %v410_v21  ;;  %v2659_v21 = vperm.slane %v566_v23, 1 }
 0x108   :  { %v362_v22 = vpop.f32.mrf.mxu0 }
 0x109   :  { %v363_v7 = vadd.f32 %v362_v22, %v2560_v4  ;;  %v411_v8 = vpop.f32.mrf.mxu1 }
 0x10b   :  { %v412_v27 = vadd.f32 %v411_v8, %v363_v7 }
 0x10d   :  { %544 = vst [vmem:[#allocation2 + $0xd0] sm:$0xff] %v412_v27 }
 0x110   :  { %v365_v31 = vpop.f32.mrf.mxu0 }
 0x111   :  { %v366_v62 = vadd.f32 %v365_v31, %v2560_v4  ;;  %v414_v37 = vpop.f32.mrf.mxu1 }
 0x113   :  { %v415_v38 = vadd.f32 %v414_v37, %v366_v62  ;;  %v568_v37 = vld [vmem:[#allocation2 + $0x8] sm:$0xff] }
 0x115   :  { %546 = vst [vmem:[#allocation2 + $0xe0] sm:$0xff] %v415_v38 }
 0x118   :  { %v367_v15 = vpop.f32.mrf.mxu0 }
 0x119   :  { %v368_v46 = vadd.f32 %v367_v15, %v2560_v4  ;;  %v416_v47 = vpop.f32.mrf.mxu1 }
 0x11b   :  { %v417_v59 = vadd.f32 %v416_v47, %v368_v46 }
 0x11d   :  { %548 = vst [vmem:[#allocation2 + $0xf0] sm:$0xff] %v417_v59 }
 0x120   :  { %v596_v60 = vpop.f32.mrf.mxu0 }
 0x121   :  { %v597_v61 = vadd.f32 %v596_v60, %v2653_v55  ;;  %v619_v32 = vpop.f32.mrf.mxu1 }
 0x123   :  { %v625_v4 = vadd.f32 %v597_v61, %v2573_v0 }
 0x125   :  { %v1798_v5 = vmul.f32 -1.442695, %v625_v4  ;;  %v570_v4 = vld [vmem:[#allocation2 + $0x18] sm:$0xff] }
 0x127   :  { %1906 = vpow2.f32 %v1798_v5 }
 0x128   :  { %v599_v63 = vpop.f32.mrf.mxu0 }
 0x129   :  { %v600_v43 = vadd.f32 %v599_v63, %v2653_v55  ;;  %v622_v15 = vpop.f32.mrf.mxu1 }
 0x12a   :  { %v623_v50 = vadd.f32 %v622_v15, %v2659_v21 }
 0x12b   :  { %v626_v44 = vadd.f32 %v600_v43, %v2590_v19  ;;  %v620_v19 = vadd.f32 %v619_v32, %v2659_v21 }
 0x12d   :  { %v1907_v6 = vpop.eup %1906  ;;  %v1799_v11 = vmul.f32 -1.442695, %v626_v44 }
 0x12e   :  { %v633_v12 = vadd.f32 1.0, %v1907_v6 }
 0x12f   :  { %1908 = vpow2.f32 %v1799_v11 }
 0x130   :  { %1910 = vrcp.f32 %v633_v12  ;;  %v646_v22 = vand.u32 2147483648, %v633_v12  ;;  %v644_v8 = vand.u32 2147483647, %v633_v12  ;;  %vm640_vm2 = vweird.f32 %v633_v12 }
 0x132   :  { %v647_v31 = vor.u32 1.1754944e-38, %v646_v22  ;;  %vm645_vm4 = vcmp.eq.f32.partialorder %v644_v8, 8.507059e+37  ;;  %v433_v22 = vpop.f32.mrf.mxu2 }
 0x133   :  { %v434_v8 = vadd.f32 %v433_v22, %v2643_v3 }
 0x135   :  { %v1909_v13 = vpop.eup %1908 }
 0x136   :  { %v1911_v14 = vpop.eup %1910  ;;  %v634_v29 = vadd.f32 1.0, %v1909_v13 }
 0x137   :  { %v636_v20 = vmul.f32 %v1911_v14, %v633_v12  ;;  %vm641_vm1 = vweird.f32 %v1911_v14 }
 0x138   :  { %1912 = vrcp.f32 %v634_v29  ;;  %vm642_vm3 = vmor %vm640_vm2, %vm641_vm1  ;;  %v661_v16 = vand.u32 2147483648, %v634_v29  ;;  %v659_v47 = vand.u32 2147483647, %v634_v29  ;;  %vm655_vm6 = vweird.f32 %v634_v29 }
 0x139   :  { %v637_v0 = vsub.f32 1.0, %v636_v20 }
 0x13a   :  { %v662_v24 = vor.u32 1.1754944e-38, %v661_v16  ;;  %vm660_vm8 = vcmp.eq.f32.partialorder %v659_v47, 8.507059e+37 }
 0x13b   :  { %v638_v7 = vmul.f32 %v1911_v14, %v637_v0 }
 0x13d   :  { %v639_v27 = vadd.f32 %v1911_v14, %v638_v7  ;;  %v482_v7 = vpop.f32.mrf.mxu3 }
 0x13e   :  { %v1913_v30 = vpop.eup %1912 }
 0x13f   :  { %v643_v33 = vsel %vm642_vm3, %v1911_v14, %v639_v27  ;;  %v651_v62 = vmul.f32 %v1913_v30, %v634_v29  ;;  %vm656_vm5 = vweird.f32 %v1913_v30  ;;  %v435_v27 = vpop.f32.mrf.mxu2 }
 0x140   :  { %v648_v38 = vsel %vm645_vm4, %v647_v31, %v643_v33  ;;  %vm657_vm7 = vmor %vm655_vm6, %vm656_vm5  ;;  %v436_v31 = vadd.f32 %v435_v27, %v2643_v3 }
 0x141   :  { %v665_v39 = vmul.f32 %v648_v38, %v620_v19  ;;  %v652_v41 = vsub.f32 1.0, %v651_v62  ;;  %v483_v19 = vadd.f32 %v482_v7, %v434_v8 }
 0x143   :  { %v667_v45 = vadd.f32 %v665_v39, %v568_v37  ;;  %v653_v46 = vmul.f32 %v1913_v30, %v652_v41  ;;  %523 = vst.msk [vmem:[#allocation2 + $0x28] sm:$0xff] %vm518_vm0, %v483_v19 }
 0x145   :  { %1914 = vtanh.f32 %v667_v45  ;;  %v654_v23 = vadd.f32 %v1913_v30, %v653_v46 }
 0x147   :  { %v658_v59 = vsel %vm657_vm7, %v1913_v30, %v654_v23  ;;  %v484_v30 = vpop.f32.mrf.mxu3  ;;  %v438_v62 = vpop.f32.mrf.mxu2 }
 0x148   :  { %v663_v60 = vsel %vm660_vm8, %v662_v24, %v658_v59  ;;  %v485_v33 = vadd.f32 %v484_v30, %v436_v31 }
 0x149   :  { %v666_v61 = vmul.f32 %v663_v60, %v623_v50 }
 0x14a   :  { %525 = vst.msk [vmem:[#allocation2 + $0x38] sm:$0xff] %vm518_vm0, %v485_v33 }
 0x14b   :  { %v1915_v5 = vpop.eup %1914  ;;  %v668_v63 = vadd.f32 %v666_v61, %v570_v4 }
 0x14c   :  { %v671_v43 = vsub.f32 0.0, %v1915_v5 }
 0x14d   :  { %1916 = vtanh.f32 %v668_v63 }
 0x14e   :  { %675 = vrot.lane.b32.xlu0 %v671_v43, %s2045_s4 }
 0x14f   :  { %v487_v37 = vpop.f32.mrf.mxu3  ;;  %v440_v15 = vpop.f32.mrf.mxu2 }
 0x150   :  { %v441_v45 = vadd.f32 %v440_v15, %v2643_v3 }
 0x153   :  { %v1917_v44 = vpop.eup %1916 }
 0x154   :  { %v672_v6 = vsub.f32 0.0, %v1917_v44 }
 0x156   :  { %677 = vrot.lane.b32.xlu1 %v672_v6, %s2045_s4  ;;  %685 = vrot.lane.b32.xlu0 %v1915_v5, %s2045_s4 }
 0x157   :  { %v489_v16 = vpop.f32.mrf.mxu3 }
 0x158   :  { %v490_v46 = vadd.f32 %v489_v16, %v441_v45 }
 0x15a   :  { %529 = vst.msk [vmem:[#allocation2 + $0x58] sm:$0xff] %vm518_vm0, %v490_v46 }
 0x15e   :  { %687 = vrot.lane.b32.xlu1 %v1917_v44, %s2045_s4 }
 0x1c0   :  { %v676_v11 = vpop.permute.xlu0 %675 }
 0x1c1   :  { %v681_v12 = vmul.f32 %v676_v11, %v648_v38  ;;  %v439_v38 = vadd.f32 %v438_v62, %v2643_v3 }
 0x1c3   :  { %v488_v39 = vadd.f32 %v487_v37, %v439_v38 }
 0x1c5   :  { %527 = vst.msk [vmem:[#allocation2 + $0x48] sm:$0xff] %vm518_vm0, %v488_v39 }
 0x1c8   :  { %v678_v13 = vpop.permute.xlu1 %677  ;;  %v686_v14 = vpop.permute.xlu0 %685 }
 0x1c9   :  { %v2667_v29 = vadd.f32 %v686_v14, %v681_v12  ;;  %v682_v20 = vmul.f32 %v678_v13, %v663_v60 }
 0x1cb   :  { %700 = vrot.lane.b32.xlu2 %v2667_v29, %s2045_s4 }
 0x1d0   :  { %v688_v32 = vpop.permute.xlu1 %687 }
 0x1d1   :  { %v2671_v0 = vadd.f32 %v688_v32, %v682_v20 }
 0x1d3   :  { %702 = vrot.lane.b32.xlu2 %v2671_v0, %s2045_s4 }
 0x225   :  { %v701_v41 = vpop.permute.xlu2 %700 }
 0x226   :  { %1800 = vmatmul.msk.f32.vlgmr.msrb.gmra.mxu2 %vm518_vm0, %v701_v41  ;;  %1802 = vmatmul.msk.f32.vlgmr.msrb.gmra.mxu3 %vm518_vm0, %v701_v41 }
 0x227   :  { %1200 = vmatpush.msrb.mxu2 %v2200_v52  ;;  %1223 = vmatpush.msrb.mxu3 %v2207_v54  ;;  %v443_v52 = vpop.f32.mrf.mxu2  ;;  %v492_v54 = vpop.f32.mrf.mxu3 }
 0x229   :  { %1201 = vmatpush.msrb.mxu2 %v2215_v56  ;;  %1224 = vmatpush.msrb.mxu3 %v2229_v58  ;;  %v444_v56 = vadd.f32 %v443_v52, %v2643_v3 }
 0x22b   :  { %1202 = vmatpush.msrb.mxu2 %v2222_v57  ;;  %1225 = vmatpush.msrb.mxu3 %v2260_v2  ;;  %v493_v57 = vadd.f32 %v492_v54, %v444_v56 }
 0x22d   :  { %v703_v47 = vpop.permute.xlu2 %702  ;;  %1203 = vmatpush.msrb.mxu2 %v2253_v1  ;;  %1226 = vmatpush.msrb.mxu3 %v2290_v10  ;;  %531 = vst.msk [vmem:[#allocation2 + $0x68] sm:$0xff] %vm518_vm0, %v493_v57 }
 0x22e   :  { %1801 = vmatmul.msk.f32.gmra.mxu2 %vm518_vm0, %v703_v47  ;;  %1803 = vmatmul.msk.f32.gmra.mxu3 %vm518_vm0, %v703_v47 }
 0x22f   :  { %1204 = vmatpush.msrb.mxu2 %v2283_v9  ;;  %1227 = vmatpush.msrb.mxu3 %v2320_v18  ;;  %v445_v58 = vpop.f32.mrf.mxu2  ;;  %v494_v1 = vpop.f32.mrf.mxu3 }
 0x230   :  { %v446_v2 = vadd.f32 %v445_v58, %v2643_v3 }
 0x231   :  { %1205 = vmatpush.msrb.mxu2 %v2313_v17  ;;  %1228 = vmatpush.msrb.mxu3 %v2368_v34 }
 0x232   :  { %v495_v9 = vadd.f32 %v494_v1, %v446_v2 }
 0x233   :  { %1206 = vmatpush.msrb.mxu2 %v2343_v25  ;;  %1229 = vmatpush.msrb.mxu3 %v2474_v35 }
 0x234   :  { %533 = vst.msk [vmem:[#allocation2 + $0x78] sm:$0xff] %vm518_vm0, %v495_v9 }
 0x235   :  { %1207 = vmatpush.msrb.mxu2 %v2403_v48  ;;  %1230 = vmatpush.msrb.mxu3 %v2532_v53 }
 0x237   :  { %v448_v10 = vpop.f32.mrf.mxu2  ;;  %v497_v17 = vpop.f32.mrf.mxu3 }
 0x238   :  { %v449_v18 = vadd.f32 %v448_v10, %v2643_v3 }
 0x23a   :  { %v498_v34 = vadd.f32 %v497_v17, %v449_v18 }
 0x23c   :  { %535 = vst.msk [vmem:[#allocation2 + $0x88] sm:$0xff] %vm518_vm0, %v498_v34 }
 0x23f   :  { %v450_v25 = vpop.f32.mrf.mxu2  ;;  %v499_v50 = vpop.f32.mrf.mxu3 }
 0x240   :  { %v451_v23 = vadd.f32 %v450_v25, %v2643_v3 }
 0x242   :  { %v500_v24 = vadd.f32 %v499_v50, %v451_v23 }
 0x244   :  { %537 = vst.msk [vmem:[#allocation2 + $0x98] sm:$0xff] %vm518_vm0, %v500_v24 }
 0x247   :  { %v453_v59 = vpop.f32.mrf.mxu2  ;;  %v502_v60 = vpop.f32.mrf.mxu3 }
 0x248   :  { %v454_v61 = vadd.f32 %v453_v59, %v2643_v3  ;;  %v695_v59 = vld [vmem:[#allocation2 + $0x28] sm:$0xff] }
 0x24a   :  { %v503_v4 = vadd.f32 %v502_v60, %v454_v61 }
 0x24c   :  { %539 = vst.msk [vmem:[#allocation2 + $0xa8] sm:$0xff] %vm518_vm0, %v503_v4 }
 0x24f   :  { %v455_v5 = vpop.f32.mrf.mxu2  ;;  %v504_v63 = vpop.f32.mrf.mxu3 }
 0x250   :  { %v456_v43 = vadd.f32 %v455_v5, %v2643_v3 }
 0x252   :  { %v505_v44 = vadd.f32 %v504_v63, %v456_v43 }
 0x254   :  { %541 = vst.msk [vmem:[#allocation2 + $0xb8] sm:$0xff] %vm518_vm0, %v505_v44 }
 0x257   :  { %v458_v6 = vpop.f32.mrf.mxu2  ;;  %v507_v11 = vpop.f32.mrf.mxu3 }
 0x258   :  { %v459_v12 = vadd.f32 %v458_v6, %v2643_v3 }
 0x25a   :  { %v508_v13 = vadd.f32 %v507_v11, %v459_v12 }
 0x25c   :  { %543 = vst.msk [vmem:[#allocation2 + $0xc8] sm:$0xff] %vm518_vm0, %v508_v13 }
 0x25f   :  { %v460_v14 = vpop.f32.mrf.mxu2  ;;  %v509_v20 = vpop.f32.mrf.mxu3 }
 0x260   :  { %v461_v32 = vadd.f32 %v460_v14, %v2643_v3  ;;  %v697_v14 = vld [vmem:[#allocation2 + $0x38] sm:$0xff] }
 0x262   :  { %v510_v22 = vadd.f32 %v509_v20, %v461_v32 }
 0x264   :  { %545 = vst.msk [vmem:[#allocation2 + $0xd8] sm:$0xff] %vm518_vm0, %v510_v22 }
 0x267   :  { %v463_v7 = vpop.f32.mrf.mxu2  ;;  %v512_v8 = vpop.f32.mrf.mxu3 }
 0x268   :  { %v464_v19 = vadd.f32 %v463_v7, %v2643_v3 }
 0x26a   :  { %v513_v27 = vadd.f32 %v512_v8, %v464_v19 }
 0x26c   :  { %547 = vst.msk [vmem:[#allocation2 + $0xe8] sm:$0xff] %vm518_vm0, %v513_v27 }
 0x26f   :  { %v465_v30 = vpop.f32.mrf.mxu2  ;;  %v514_v31 = vpop.f32.mrf.mxu3 }
 0x270   :  { %v466_v33 = vadd.f32 %v465_v30, %v2643_v3 }
 0x272   :  { %v515_v62 = vadd.f32 %v514_v31, %v466_v33 }
 0x274   :  { %549 = vst.msk [vmem:[#allocation2 + $0xf8] sm:$0xff] %vm518_vm0, %v515_v62 }
 0x2a9   :  { %v725_v37 = vpop.f32.mrf.mxu2  ;;  %v748_v1 = vpop.f32.mrf.mxu3 }
 0x2aa   :  { %v726_v38 = vadd.f32 %v725_v37, %v2653_v55  ;;  %v749_v18 = vadd.f32 %v748_v1, %v2659_v21 }
 0x2ac   :  { %v754_v39 = vadd.f32 %v726_v38, %v2602_v26  ;;  %v2758_v38 = vld [vmem:[%s2998_s3 + $0x60] sm:$0xff] }
 0x2ae   :  { %v1804_v41 = vmul.f32 -1.442695, %v754_v39  ;;  %v2764_v39 = vld [vmem:[%s2998_s3 + $0x68] sm:$0xff] }
 0x2b0   :  { %1918 = vpow2.f32 %v1804_v41  ;;  %v2770_v41 = vld [vmem:[%s2998_s3 + $0x50] sm:$0xff] }
 0x2b1   :  { %v728_v15 = vpop.f32.mrf.mxu2  ;;  %v751_v63 = vpop.f32.mrf.mxu3 }
 0x2b2   :  { %v729_v16 = vadd.f32 %v728_v15, %v2653_v55  ;;  %v752_v6 = vadd.f32 %v751_v63, %v2659_v21  ;;  %v2776_v15 = vld [vmem:[%s2998_s3 + $0x58] sm:$0xff] }
 0x2b4   :  { %v755_v45 = vadd.f32 %v729_v16, %v2609_v28  ;;  %v2782_v16 = vld [vmem:[%s2998_s3 + $0x40] sm:$0xff] }
 0x2b6   :  { %v1919_v46 = vpop.eup %1918  ;;  %v1805_v47 = vmul.f32 -1.442695, %v755_v45  ;;  %v2788_v45 = vld [vmem:[%s2998_s3 + $0x48] sm:$0xff] }
 0x2b7   :  { %v762_v52 = vadd.f32 1.0, %v1919_v46  ;;  %v2794_v46 = vld [vmem:[%s2998_s3 + $0x30] sm:$0xff] }
 0x2b8   :  { %1920 = vpow2.f32 %v1805_v47  ;;  %v2800_v47 = vld [vmem:[%s2998_s3 + $0x38] sm:$0xff] }
 0x2b9   :  { %1922 = vrcp.f32 %v762_v52  ;;  %v775_v26 = vand.u32 2147483648, %v762_v52  ;;  %v773_v9 = vand.u32 2147483647, %v762_v52  ;;  %vm769_vm10 = vweird.f32 %v762_v52 }
 0x2bb   :  { %v776_v28 = vor.u32 1.1754944e-38, %v775_v26  ;;  %vm774_vm12 = vcmp.eq.f32.partialorder %v773_v9, 8.507059e+37 }
 0x2be   :  { %v1921_v3 = vpop.eup %1920 }
 0x2bf   :  { %v1923_v54 = vpop.eup %1922  ;;  %v763_v56 = vadd.f32 1.0, %v1921_v3  ;;  %v2812_v3 = vld [vmem:[%s2998_s3 + $0x28] sm:$0xff] }
 0x2c0   :  { %v765_v57 = vmul.f32 %v1923_v54, %v762_v52  ;;  %vm770_vm9 = vweird.f32 %v1923_v54  ;;  %v2806_v52 = vld [vmem:[%s2998_s3 + $0x20] sm:$0xff] }
 0x2c1   :  { %1924 = vrcp.f32 %v763_v56  ;;  %vm771_vm11 = vmor %vm769_vm10, %vm770_vm9  ;;  %v790_v60 = vand.u32 2147483648, %v763_v56  ;;  %v788_v5 = vand.u32 2147483647, %v763_v56  ;;  %vm784_vm14 = vweird.f32 %v763_v56 }
 0x2c2   :  { %v766_v58 = vsub.f32 1.0, %v765_v57 }
 0x2c3   :  { %v791_v44 = vor.u32 1.1754944e-38, %v790_v60  ;;  %vm789_vm1 = vcmp.eq.f32.partialorder %v788_v5, 8.507059e+37 }
 0x2c4   :  { %v767_v2 = vmul.f32 %v1923_v54, %v766_v58 }
 0x2c6   :  { %v768_v10 = vadd.f32 %v1923_v54, %v767_v2 }
 0x2c7   :  { %v1925_v17 = vpop.eup %1924 }
 0x2c8   :  { %v772_v34 = vsel %vm771_vm11, %v1923_v54, %v768_v10  ;;  %v780_v25 = vmul.f32 %v1925_v17, %v763_v56  ;;  %vm785_vm13 = vweird.f32 %v1925_v17  ;;  %v2818_v54 = vld [vmem:[%s2998_s3 + $0x10] sm:$0xff] }
 0x2c9   :  { %v777_v50 = vsel %vm774_vm12, %v776_v28, %v772_v34  ;;  %vm786_vm15 = vmor %vm784_vm14, %vm785_vm13 }
 0x2ca   :  { %v794_v23 = vmul.f32 %v777_v50, %v749_v18  ;;  %v781_v24 = vsub.f32 1.0, %v780_v25 }
 0x2cc   :  { %v796_v61 = vadd.f32 %v794_v23, %v695_v59  ;;  %v782_v4 = vmul.f32 %v1925_v17, %v781_v24 }
 0x2ce   :  { %1926 = vtanh.f32 %v796_v61  ;;  %v783_v43 = vadd.f32 %v1925_v17, %v782_v4  ;;  %v816_v61 = vld [vmem:[#allocation2 + $0x48] sm:$0xff] }
 0x2d0   :  { %v787_v11 = vsel %vm786_vm15, %v1925_v17, %v783_v43 }
 0x2d1   :  { %v792_v12 = vsel %vm789_vm1, %v791_v44, %v787_v11 }
 0x2d2   :  { %v795_v13 = vmul.f32 %v792_v12, %v752_v6 }
 0x2d4   :  { %v1927_v20 = vpop.eup %1926  ;;  %v797_v32 = vadd.f32 %v795_v13, %v697_v14 }
 0x2d5   :  { %802 = vrot.lane.b32.xlu0 %v1927_v20, %s2045_s4 }
 0x2d6   :  { %1928 = vtanh.f32 %v797_v32 }
 0x2dc   :  { %v1929_v22 = vpop.eup %1928 }
 0x2dd   :  { %804 = vrot.lane.b32.xlu1 %v1929_v22, %s2045_s4 }
 0x347   :  { %v803_v7 = vpop.permute.xlu0 %802 }
 0x348   :  { %v808_v8 = vsub.f32 %v2667_v29, %v803_v7  ;;  %v2746_v29 = vld [vmem:[%s2998_s3 + $0x70] sm:$0xff] }
 0x34a   :  { %v810_v19 = vmul.f32 %v808_v8, %v777_v50 }
 0x34c   :  { %v2732_v27 = vadd.f32 %v810_v19, %v803_v7 }
 0x34e   :  { %821 = vrot.lane.b32.xlu2 %v2732_v27, %s2045_s4 }
 0x34f   :  { %v805_v30 = vpop.permute.xlu1 %804 }
 0x350   :  { %v809_v31 = vsub.f32 %v2671_v0, %v805_v30  ;;  %v2752_v0 = vld [vmem:[%s2998_s3 + $0x78] sm:$0xff] }
 0x352   :  { %v811_v33 = vmul.f32 %v809_v31, %v792_v12 }
 0x354   :  { %v2737_v62 = vadd.f32 %v811_v33, %v805_v30  ;;  %v818_v33 = vld [vmem:[#allocation2 + $0x58] sm:$0xff] }
 0x356   :  { %823 = vrot.lane.b32.xlu0 %v2737_v62, %s2045_s4 }
 0x3a8   :  { %v822_v37 = vpop.permute.xlu2 %821 }
 0x3a9   :  { %1806 = vmatmul.msk.f32.vlgmr.msra.gmra.mxu0 %vm518_vm0, %v822_v37  ;;  %1808 = vmatmul.msk.f32.vlgmr.msra.gmra.mxu1 %vm518_vm0, %v822_v37 }
 0x3aa   :  { %1321 = vmatpush.msra.mxu0 %v2746_v29  ;;  %1344 = vmatpush.msra.mxu1 %v2752_v0 }
 0x3ac   :  { %1322 = vmatpush.msra.mxu0 %v2758_v38  ;;  %1345 = vmatpush.msra.mxu1 %v2764_v39 }
 0x3ae   :  { %1323 = vmatpush.msra.mxu0 %v2770_v41  ;;  %1346 = vmatpush.msra.mxu1 %v2776_v15 }
 0x3b0   :  { %1324 = vmatpush.msra.mxu0 %v2782_v16  ;;  %1347 = vmatpush.msra.mxu1 %v2788_v45 }
 0x3b2   :  { %1325 = vmatpush.msra.mxu0 %v2794_v46  ;;  %1348 = vmatpush.msra.mxu1 %v2800_v47 }
 0x3b4   :  { %1326 = vmatpush.msra.mxu0 %v2806_v52  ;;  %1349 = vmatpush.msra.mxu1 %v2812_v3 }
 0x3b6   :  { %1327 = vmatpush.msra.mxu0 %v2818_v54  ;;  %1350 = vmatpush.msra.mxu1 %v2474_v35 }
 0x3b8   :  { %1328 = vmatpush.msra.mxu0 %v2403_v48  ;;  %1351 = vmatpush.msra.mxu1 %v2532_v53 }
 0x3c8   :  { %v824_v56 = vpop.permute.xlu0 %823 }
 0x3c9   :  { %1807 = vmatmul.msk.f32.gmra.mxu0 %vm518_vm0, %v824_v56  ;;  %1809 = vmatmul.msk.f32.gmra.mxu1 %vm518_vm0, %v824_v56 }
 0x426   :  { %v846_v57 = vpop.f32.mrf.mxu0  ;;  %v869_v18 = vpop.f32.mrf.mxu1 }
 0x427   :  { %v847_v58 = vadd.f32 %v846_v57, %v2653_v55  ;;  %v870_v50 = vadd.f32 %v869_v18, %v2659_v21 }
 0x429   :  { %v875_v1 = vadd.f32 %v847_v58, %v2614_v36 }
 0x42b   :  { %v1810_v26 = vmul.f32 -1.442695, %v875_v1 }
 0x42d   :  { %1930 = vpow2.f32 %v1810_v26 }
 0x433   :  { %v1931_v2 = vpop.eup %1930 }
 0x434   :  { %v883_v9 = vadd.f32 1.0, %v1931_v2 }
 0x436   :  { %1932 = vrcp.f32 %v883_v9  ;;  %v896_v17 = vand.u32 2147483648, %v883_v9  ;;  %v894_v28 = vand.u32 2147483647, %v883_v9  ;;  %vm890_vm3 = vweird.f32 %v883_v9 }
 0x438   :  { %v897_v25 = vor.u32 1.1754944e-38, %v896_v17  ;;  %vm895_vm5 = vcmp.eq.f32.partialorder %v894_v28, 8.507059e+37 }
 0x43c   :  { %v1933_v35 = vpop.eup %1932 }
 0x43d   :  { %v886_v10 = vmul.f32 %v1933_v35, %v883_v9  ;;  %vm891_vm2 = vweird.f32 %v1933_v35 }
 0x43e   :  { %vm892_vm4 = vmor %vm890_vm3, %vm891_vm2 }
 0x43f   :  { %v887_v48 = vsub.f32 1.0, %v886_v10 }
 0x441   :  { %v888_v53 = vmul.f32 %v1933_v35, %v887_v48 }
 0x443   :  { %v889_v34 = vadd.f32 %v1933_v35, %v888_v53 }
 0x445   :  { %v893_v36 = vsel %vm892_vm4, %v1933_v35, %v889_v34 }
 0x446   :  { %v898_v23 = vsel %vm895_vm5, %v897_v25, %v893_v36  ;;  %v849_v24 = vpop.f32.mrf.mxu0  ;;  %v872_v22 = vpop.f32.mrf.mxu1 }
 0x447   :  { %v915_v59 = vmul.f32 %v898_v23, %v870_v50  ;;  %v850_v60 = vadd.f32 %v849_v24, %v2653_v55  ;;  %v873_v8 = vadd.f32 %v872_v22, %v2659_v21 }
 0x449   :  { %v917_v4 = vadd.f32 %v915_v59, %v816_v61  ;;  %v876_v5 = vadd.f32 %v850_v60, %v2617_v40 }
 0x44b   :  { %1934 = vtanh.f32 %v917_v4  ;;  %v1811_v63 = vmul.f32 -1.442695, %v876_v5 }
 0x44d   :  { %1936 = vpow2.f32 %v1811_v63  ;;  %v937_v63 = vld [vmem:[#allocation2 + $0x68] sm:$0xff] }
 0x451   :  { %v1935_v43 = vpop.eup %1934 }
 0x452   :  { %923 = vrot.lane.b32.xlu1 %v1935_v43, %s2045_s4 }
 0x453   :  { %v1937_v44 = vpop.eup %1936 }
 0x454   :  { %v884_v6 = vadd.f32 1.0, %v1937_v44 }
 0x456   :  { %1938 = vrcp.f32 %v884_v6  ;;  %v911_v14 = vand.u32 2147483648, %v884_v6  ;;  %v909_v32 = vand.u32 2147483647, %v884_v6  ;;  %vm905_vm7 = vweird.f32 %v884_v6 }
 0x458   :  { %v912_v40 = vor.u32 1.1754944e-38, %v911_v14  ;;  %vm910_vm9 = vcmp.eq.f32.partialorder %v909_v32, 8.507059e+37 }
 0x45c   :  { %v1939_v11 = vpop.eup %1938 }
 0x45d   :  { %v901_v12 = vmul.f32 %v1939_v11, %v884_v6  ;;  %vm906_vm6 = vweird.f32 %v1939_v11 }
 0x45e   :  { %vm907_vm8 = vmor %vm905_vm7, %vm906_vm6 }
 0x45f   :  { %v902_v13 = vsub.f32 1.0, %v901_v12 }
 0x461   :  { %v903_v20 = vmul.f32 %v1939_v11, %v902_v13 }
 0x463   :  { %v904_v7 = vadd.f32 %v1939_v11, %v903_v20 }
 0x465   :  { %v908_v19 = vsel %vm907_vm8, %v1939_v11, %v904_v7 }
 0x466   :  { %v913_v30 = vsel %vm910_vm9, %v912_v40, %v908_v19  ;;  %v939_v40 = vld [vmem:[#allocation2 + $0x78] sm:$0xff] }
 0x467   :  { %v916_v31 = vmul.f32 %v913_v30, %v873_v8 }
 0x469   :  { %v918_v37 = vadd.f32 %v916_v31, %v818_v33 }
 0x46b   :  { %1940 = vtanh.f32 %v918_v37 }
 0x471   :  { %v1941_v56 = vpop.eup %1940 }
 0x472   :  { %925 = vrot.lane.b32.xlu2 %v1941_v56, %s2045_s4 }
 0x4c4   :  { %v924_v57 = vpop.permute.xlu1 %923 }
 0x4c5   :  { %v929_v58 = vsub.f32 %v2732_v27, %v924_v57 }
 0x4c7   :  { %v931_v1 = vmul.f32 %v929_v58, %v898_v23 }
 0x4c9   :  { %v2835_v26 = vadd.f32 %v931_v1, %v924_v57 }
 0x4cb   :  { %942 = vrot.lane.b32.xlu0 %v2835_v26, %s2045_s4 }
 0x4cc   :  { %v926_v2 = vpop.permute.xlu2 %925 }
 0x4cd   :  { %v930_v9 = vsub.f32 %v2737_v62, %v926_v2  ;;  %v2015_v62 = vld [vmem:[%s2998_s3 + $0x18] sm:$0xff] }
 0x4cf   :  { %v932_v35 = vmul.f32 %v930_v9, %v913_v30 }
 0x4d1   :  { %v2840_v10 = vadd.f32 %v932_v35, %v926_v2 }
 0x4d3   :  { %944 = vrot.lane.b32.xlu1 %v2840_v10, %s2045_s4 }
 0x53d   :  { %v943_v48 = vpop.permute.xlu0 %942 }
 0x53e   :  { %1812 = vmatmul.msk.f32.vlgmr.msra.gmra.mxu2 %vm518_vm0, %v943_v48  ;;  %1814 = vmatmul.msk.f32.vlgmr.msra.gmra.mxu3 %vm518_vm0, %v943_v48 }
 0x53f   :  { %1442 = vmatpush.msra.mxu2 %v2746_v29  ;;  %1465 = vmatpush.msra.mxu3 %v2752_v0  ;;  %v2016_v29 = vld [vmem:[%s2998_s3] sm:$0xff]  ;;  %v2017_v0 = vld [vmem:[%s2998_s3 + $0x8] sm:$0xff] }
 0x541   :  { %1443 = vmatpush.msra.mxu2 %v2758_v38  ;;  %1466 = vmatpush.msra.mxu3 %v2764_v39 }
 0x543   :  { %1444 = vmatpush.msra.mxu2 %v2770_v41  ;;  %1467 = vmatpush.msra.mxu3 %v2776_v15 }
 0x545   :  { %v945_v27 = vpop.permute.xlu1 %944  ;;  %1445 = vmatpush.msra.mxu2 %v2782_v16  ;;  %1468 = vmatpush.msra.mxu3 %v2788_v45 }
 0x546   :  { %1813 = vmatmul.msk.f32.gmra.mxu2 %vm518_vm0, %v945_v27  ;;  %1815 = vmatmul.msk.f32.gmra.mxu3 %vm518_vm0, %v945_v27 }
 0x547   :  { %1446 = vmatpush.msra.mxu2 %v2794_v46  ;;  %1469 = vmatpush.msra.mxu3 %v2800_v47 }
 0x549   :  { %1447 = vmatpush.msra.mxu2 %v2806_v52  ;;  %1470 = vmatpush.msra.mxu3 %v2812_v3 }
 0x54b   :  { %1448 = vmatpush.msra.mxu2 %v2818_v54  ;;  %1471 = vmatpush.msra.mxu3 %v2015_v62 }
 0x54d   :  { %1449 = vmatpush.msra.mxu2 %v2016_v29  ;;  %1472 = vmatpush.msra.mxu3 %v2017_v0  ;;  %v1059_v0 = vld [vmem:[#allocation2 + $0x90] sm:$0xff] }
 0x5c1   :  { %v967_v38 = vpop.f32.mrf.mxu2  ;;  %v990_v34 = vpop.f32.mrf.mxu3 }
 0x5c2   :  { %v968_v39 = vadd.f32 %v967_v38, %v2653_v55  ;;  %v991_v24 = vadd.f32 %v990_v34, %v2659_v21 }
 0x5c4   :  { %v996_v41 = vadd.f32 %v968_v39, %v2622_v42 }
 0x5c6   :  { %v1816_v15 = vmul.f32 -1.442695, %v996_v41 }
 0x5c8   :  { %1942 = vpow2.f32 %v1816_v15 }
 0x5c9   :  { %v970_v16 = vpop.f32.mrf.mxu2  ;;  %v993_v12 = vpop.f32.mrf.mxu3 }
 0x5ca   :  { %v971_v45 = vadd.f32 %v970_v16, %v2653_v55  ;;  %v994_v20 = vadd.f32 %v993_v12, %v2659_v21  ;;  %v1060_v12 = vld [vmem:[#allocation2 + $0x98] sm:$0xff] }
 0x5cc   :  { %v997_v46 = vadd.f32 %v971_v45, %v2625_v49 }
 0x5ce   :  { %v1943_v47 = vpop.eup %1942  ;;  %v1817_v52 = vmul.f32 -1.442695, %v997_v46 }
 0x5cf   :  { %v1004_v3 = vadd.f32 1.0, %v1943_v47 }
 0x5d0   :  { %1944 = vpow2.f32 %v1817_v52 }
 0x5d1   :  { %1946 = vrcp.f32 %v1004_v3  ;;  %v1017_v42 = vand.u32 2147483648, %v1004_v3  ;;  %v1015_v50 = vand.u32 2147483647, %v1004_v3  ;;  %vm1011_vm11 = vweird.f32 %v1004_v3 }
 0x5d3   :  { %v1018_v49 = vor.u32 1.1754944e-38, %v1017_v42  ;;  %vm1016_vm13 = vcmp.eq.f32.partialorder %v1015_v50, 8.507059e+37 }
 0x5d6   :  { %v1945_v54 = vpop.eup %1944 }
 0x5d7   :  { %v1947_v17 = vpop.eup %1946  ;;  %v1005_v53 = vadd.f32 1.0, %v1945_v54 }
 0x5d8   :  { %v1007_v28 = vmul.f32 %v1947_v17, %v1004_v3  ;;  %vm1012_vm10 = vweird.f32 %v1947_v17 }
 0x5d9   :  { %1948 = vrcp.f32 %v1005_v53  ;;  %vm1013_vm12 = vmor %vm1011_vm11, %vm1012_vm10  ;;  %v1032_v43 = vand.u32 2147483648, %v1005_v53  ;;  %v1030_v11 = vand.u32 2147483647, %v1005_v53  ;;  %vm1026_vm15 = vweird.f32 %v1005_v53 }
 0x5da   :  { %v1008_v18 = vsub.f32 1.0, %v1007_v28 }
 0x5db   :  { %v1033_v14 = vor.u32 1.1754944e-38, %v1032_v43  ;;  %vm1031_vm2 = vcmp.eq.f32.partialorder %v1030_v11, 8.507059e+37 }
 0x5dc   :  { %v1009_v25 = vmul.f32 %v1947_v17, %v1008_v18 }
 0x5de   :  { %v1010_v36 = vadd.f32 %v1947_v17, %v1009_v25 }
 0x5df   :  { %v1949_v23 = vpop.eup %1948 }
 0x5e0   :  { %v1014_v59 = vsel %vm1013_vm12, %v1947_v17, %v1010_v36  ;;  %v1022_v60 = vmul.f32 %v1949_v23, %v1005_v53  ;;  %vm1027_vm14 = vweird.f32 %v1949_v23 }
 0x5e1   :  { %v1019_v61 = vsel %vm1016_vm13, %v1018_v49, %v1014_v59  ;;  %vm1028_vm1 = vmor %vm1026_vm15, %vm1027_vm14  ;;  %v1058_v49 = vld [vmem:[#allocation2 + $0x88] sm:$0xff] }
 0x5e2   :  { %v1036_v4 = vmul.f32 %v1019_v61, %v991_v24  ;;  %v1023_v5 = vsub.f32 1.0, %v1022_v60 }
 0x5e4   :  { %v1038_v44 = vadd.f32 %v1036_v4, %v937_v63  ;;  %v1024_v6 = vmul.f32 %v1949_v23, %v1023_v5 }
 0x5e6   :  { %1950 = vtanh.f32 %v1038_v44  ;;  %v1025_v13 = vadd.f32 %v1949_v23, %v1024_v6 }
 0x5e8   :  { %v1029_v32 = vsel %vm1028_vm1, %v1949_v23, %v1025_v13 }
 0x5e9   :  { %v1034_v22 = vsel %vm1031_vm2, %v1033_v14, %v1029_v32 }
 0x5ea   :  { %v1037_v7 = vmul.f32 %v1034_v22, %v994_v20 }
 0x5ec   :  { %v1951_v8 = vpop.eup %1950  ;;  %v1039_v19 = vadd.f32 %v1037_v7, %v939_v40 }
 0x5ed   :  { %1044 = vrot.lane.b32.xlu2 %v1951_v8, %s2045_s4 }
 0x5ee   :  { %1952 = vtanh.f32 %v1039_v19 }
 0x5f4   :  { %v1953_v30 = vpop.eup %1952 }
 0x5f5   :  { %1046 = vrot.lane.b32.xlu0 %v1953_v30, %s2045_s4 }
 0x647   :  { %v1045_v31 = vpop.permute.xlu2 %1044 }
 0x648   :  { %v1050_v33 = vsub.f32 %v2835_v26, %v1045_v31 }
 0x64a   :  { %v1052_v37 = vmul.f32 %v1050_v33, %v1019_v61 }
 0x64c   :  { %v2879_v56 = vadd.f32 %v1052_v37, %v1045_v31 }
 0x64e   :  { %1063 = vrot.lane.b32.xlu1 %v2879_v56, %s2045_s4 }
 0x667   :  { %v1047_v57 = vpop.permute.xlu0 %1046 }
 0x668   :  { %v1051_v58 = vsub.f32 %v2840_v10, %v1047_v57 }
 0x66a   :  { %v1053_v1 = vmul.f32 %v1051_v58, %v1034_v22  ;;  %v1178_v58 = vld [vmem:[#allocation2 + $0xa0] sm:$0xff] }
 0x66c   :  { %v2884_v2 = vadd.f32 %v1053_v1, %v1047_v57 }
 0x66e   :  { %1065 = vrot.lane.b32.xlu2 %v2884_v2, %s2045_s4 }
 0x6c0   :  { %v1064_v9 = vpop.permute.xlu1 %1063 }
 0x6c1   :  { %1818 = vmatmul.msk.f32.vlgmr.msrb.gmra.mxu0 %vm518_vm0, %v1064_v9  ;;  %1820 = vmatmul.msk.f32.vlgmr.msrb.gmra.mxu1 %vm518_vm0, %v1064_v9 }
 0x6c8   :  { %v1066_v26 = vpop.permute.xlu2 %1065 }
 0x6c9   :  { %1819 = vmatmul.msk.f32.gmra.mxu0 %vm518_vm0, %v1066_v26  ;;  %1821 = vmatmul.msk.f32.gmra.mxu1 %vm518_vm0, %v1066_v26 }
 0x73e   :  { %v1088_v35 = vpop.f32.mrf.mxu0  ;;  %v1111_v3 = vpop.f32.mrf.mxu1 }
 0x73f   :  { %v1089_v48 = vadd.f32 %v1088_v35, %v2653_v55  ;;  %v1112_v34 = vadd.f32 %v1111_v3, %v2659_v21  ;;  %v1180_v3 = vld [vmem:[#allocation2 + $0xb0] sm:$0xff] }
 0x741   :  { %v1117_v10 = vadd.f32 %v1089_v48, %v2630_v51 }
 0x743   :  { %v1822_v27 = vmul.f32 -1.442695, %v1117_v10 }
 0x745   :  { %1954 = vpow2.f32 %v1822_v27 }
 0x746   :  { %v1091_v62 = vpop.f32.mrf.mxu0  ;;  %v1114_v4 = vpop.f32.mrf.mxu1 }
 0x747   :  { %v1092_v29 = vadd.f32 %v1091_v62, %v2653_v55  ;;  %v1115_v43 = vadd.f32 %v1114_v4, %v2659_v21 }
 0x749   :  { %v1118_v38 = vadd.f32 %v1092_v29, %v1059_v0 }
 0x74b   :  { %v1955_v39 = vpop.eup %1954  ;;  %v1823_v41 = vmul.f32 -1.442695, %v1118_v38 }
 0x74c   :  { %v1125_v15 = vadd.f32 1.0, %v1955_v39 }
 0x74d   :  { %1956 = vpow2.f32 %v1823_v41 }
 0x74e   :  { %1958 = vrcp.f32 %v1125_v15  ;;  %v1138_v51 = vand.u32 2147483648, %v1125_v15  ;;  %v1136_v17 = vand.u32 2147483647, %v1125_v15  ;;  %vm1132_vm4 = vweird.f32 %v1125_v15 }
 0x750   :  { %v1139_v18 = vor.u32 1.1754944e-38, %v1138_v51  ;;  %vm1137_vm6 = vcmp.eq.f32.partialorder %v1136_v17, 8.507059e+37 }
 0x753   :  { %v1957_v16 = vpop.eup %1956 }
 0x754   :  { %v1959_v45 = vpop.eup %1958  ;;  %v1126_v46 = vadd.f32 1.0, %v1957_v16 }
 0x755   :  { %v1128_v47 = vmul.f32 %v1959_v45, %v1125_v15  ;;  %vm1133_vm3 = vweird.f32 %v1959_v45 }
 0x756   :  { %1960 = vrcp.f32 %v1126_v46  ;;  %vm1134_vm5 = vmor %vm1132_vm4, %vm1133_vm3  ;;  %v1153_v24 = vand.u32 2147483648, %v1126_v46  ;;  %v1151_v61 = vand.u32 2147483647, %v1126_v46  ;;  %vm1147_vm8 = vweird.f32 %v1126_v46 }
 0x757   :  { %v1129_v52 = vsub.f32 1.0, %v1128_v47 }
 0x758   :  { %v1154_v63 = vor.u32 1.1754944e-38, %v1153_v24  ;;  %vm1152_vm10 = vcmp.eq.f32.partialorder %v1151_v61, 8.507059e+37 }
 0x759   :  { %v1130_v54 = vmul.f32 %v1959_v45, %v1129_v52  ;;  %v1179_v52 = vld [vmem:[#allocation2 + $0xa8] sm:$0xff] }
 0x75b   :  { %v1131_v53 = vadd.f32 %v1959_v45, %v1130_v54 }
 0x75c   :  { %v1961_v28 = vpop.eup %1960 }
 0x75d   :  { %v1135_v42 = vsel %vm1134_vm5, %v1959_v45, %v1131_v53  ;;  %v1143_v25 = vmul.f32 %v1961_v28, %v1126_v46  ;;  %vm1148_vm7 = vweird.f32 %v1961_v28 }
 0x75e   :  { %v1140_v50 = vsel %vm1137_vm6, %v1139_v18, %v1135_v42  ;;  %vm1149_vm9 = vmor %vm1147_vm8, %vm1148_vm7 }
 0x75f   :  { %v1157_v36 = vmul.f32 %v1140_v50, %v1112_v34  ;;  %v1144_v23 = vsub.f32 1.0, %v1143_v25 }
 0x761   :  { %v1159_v59 = vadd.f32 %v1157_v36, %v1058_v49  ;;  %v1145_v60 = vmul.f32 %v1961_v28, %v1144_v23 }
 0x763   :  { %1962 = vtanh.f32 %v1159_v59  ;;  %v1146_v5 = vadd.f32 %v1961_v28, %v1145_v60 }
 0x765   :  { %v1150_v44 = vsel %vm1149_vm9, %v1961_v28, %v1146_v5 }
 0x766   :  { %v1155_v6 = vsel %vm1152_vm10, %v1154_v63, %v1150_v44  ;;  %v1181_v63 = vld [vmem:[#allocation2 + $0xb8] sm:$0xff] }
 0x767   :  { %v1158_v11 = vmul.f32 %v1155_v6, %v1115_v43 }
 0x769   :  { %v1963_v13 = vpop.eup %1962  ;;  %v1160_v14 = vadd.f32 %v1158_v11, %v1060_v12 }
 0x76a   :  { %1165 = vrot.lane.b32.xlu0 %v1963_v13, %s2045_s4 }
 0x76b   :  { %1964 = vtanh.f32 %v1160_v14 }
 0x771   :  { %v1965_v20 = vpop.eup %1964 }
 0x772   :  { %1167 = vrot.lane.b32.xlu1 %v1965_v20, %s2045_s4 }
 0x7dc   :  { %v1166_v32 = vpop.permute.xlu0 %1165 }
 0x7dd   :  { %v1171_v22 = vsub.f32 %v2879_v56, %v1166_v32 }
 0x7df   :  { %v1173_v7 = vmul.f32 %v1171_v22, %v1140_v50 }
 0x7e1   :  { %v2900_v40 = vadd.f32 %v1173_v7, %v1166_v32 }
 0x7e3   :  { %1184 = vrot.lane.b32.xlu2 %v2900_v40, %s2045_s4 }
 0x7e4   :  { %v1168_v8 = vpop.permute.xlu1 %1167 }
 0x7e5   :  { %v1172_v19 = vsub.f32 %v2884_v2, %v1168_v8 }
 0x7e7   :  { %v1174_v30 = vmul.f32 %v1172_v19, %v1155_v6 }
 0x7e9   :  { %v2905_v31 = vadd.f32 %v1174_v30, %v1168_v8  ;;  %v1299_v30 = vld [vmem:[#allocation2 + $0xc0] sm:$0xff] }
 0x7eb   :  { %1186 = vrot.lane.b32.xlu0 %v2905_v31, %s2045_s4 }
 0x83d   :  { %v1185_v33 = vpop.permute.xlu2 %1184 }
 0x83e   :  { %1824 = vmatmul.msk.f32.vlgmr.msrb.gmra.mxu2 %vm518_vm0, %v1185_v33  ;;  %1826 = vmatmul.msk.f32.vlgmr.msrb.gmra.mxu3 %vm518_vm0, %v1185_v33 }
 0x85d   :  { %v1187_v37 = vpop.permute.xlu0 %1186 }
 0x85e   :  { %1825 = vmatmul.msk.f32.gmra.mxu2 %vm518_vm0, %v1187_v37  ;;  %1827 = vmatmul.msk.f32.gmra.mxu3 %vm518_vm0, %v1187_v37 }
 0x8c1   :  { %v1209_v56 = vpop.f32.mrf.mxu2  ;;  %v1232_v0 = vpop.f32.mrf.mxu3 }
 0x8c2   :  { %v1210_v57 = vadd.f32 %v1209_v56, %v2653_v55  ;;  %v1233_v41 = vadd.f32 %v1232_v0, %v2659_v21 }
 0x8c4   :  { %v1238_v1 = vadd.f32 %v1210_v57, %v1178_v58  ;;  %v1301_v57 = vld [vmem:[#allocation2 + $0xd0] sm:$0xff] }
 0x8c6   :  { %v1828_v2 = vmul.f32 -1.442695, %v1238_v1 }
 0x8c8   :  { %1966 = vpow2.f32 %v1828_v2 }
 0x8ce   :  { %v1967_v9 = vpop.eup %1966 }
 0x8cf   :  { %v1246_v26 = vadd.f32 1.0, %v1967_v9 }
 0x8d1   :  { %1968 = vrcp.f32 %v1246_v26  ;;  %v1259_v27 = vand.u32 2147483648, %v1246_v26  ;;  %v1257_v29 = vand.u32 2147483647, %v1246_v26  ;;  %vm1253_vm12 = vweird.f32 %v1246_v26 }
 0x8d3   :  { %v1260_v39 = vor.u32 1.1754944e-38, %v1259_v27  ;;  %vm1258_vm14 = vcmp.eq.f32.partialorder %v1257_v29, 8.507059e+37 }
 0x8d7   :  { %v1969_v35 = vpop.eup %1968 }
 0x8d8   :  { %v1249_v48 = vmul.f32 %v1969_v35, %v1246_v26  ;;  %vm1254_vm11 = vweird.f32 %v1969_v35 }
 0x8d9   :  { %vm1255_vm13 = vmor %vm1253_vm12, %vm1254_vm11 }
 0x8da   :  { %v1250_v10 = vsub.f32 1.0, %v1249_v48 }
 0x8dc   :  { %v1251_v62 = vmul.f32 %v1969_v35, %v1250_v10 }
 0x8de   :  { %v1252_v38 = vadd.f32 %v1969_v35, %v1251_v62 }
 0x8e0   :  { %v1256_v15 = vsel %vm1255_vm13, %v1969_v35, %v1252_v38 }
 0x8e1   :  { %v1261_v16 = vsel %vm1258_vm14, %v1260_v39, %v1256_v15  ;;  %v1212_v45 = vpop.f32.mrf.mxu2  ;;  %v1235_v49 = vpop.f32.mrf.mxu3 }
 0x8e2   :  { %v1278_v46 = vmul.f32 %v1261_v16, %v1233_v41  ;;  %v1213_v47 = vadd.f32 %v1212_v45, %v2653_v55  ;;  %v1236_v60 = vadd.f32 %v1235_v49, %v2659_v21  ;;  %v1302_v49 = vld [vmem:[#allocation2 + $0xd8] sm:$0xff] }
 0x8e4   :  { %v1280_v51 = vadd.f32 %v1278_v46, %v1179_v52  ;;  %v1239_v54 = vadd.f32 %v1213_v47, %v1180_v3 }
 0x8e6   :  { %1970 = vtanh.f32 %v1280_v51  ;;  %v1829_v17 = vmul.f32 -1.442695, %v1239_v54  ;;  %v1300_v51 = vld [vmem:[#allocation2 + $0xc8] sm:$0xff] }
 0x8e8   :  { %1972 = vpow2.f32 %v1829_v17 }
 0x8ec   :  { %v1971_v53 = vpop.eup %1970 }
 0x8ed   :  { %1286 = vrot.lane.b32.xlu1 %v1971_v53, %s2045_s4 }
 0x8ee   :  { %v1973_v28 = vpop.eup %1972 }
 0x8ef   :  { %v1247_v18 = vadd.f32 1.0, %v1973_v28 }
 0x8f1   :  { %1974 = vrcp.f32 %v1247_v18  ;;  %v1274_v50 = vand.u32 2147483648, %v1247_v18  ;;  %v1272_v23 = vand.u32 2147483647, %v1247_v18  ;;  %vm1268_vm1 = vweird.f32 %v1247_v18 }
 0x8f3   :  { %v1275_v59 = vor.u32 1.1754944e-38, %v1274_v50  ;;  %vm1273_vm3 = vcmp.eq.f32.partialorder %v1272_v23, 8.507059e+37 }
 0x8f7   :  { %v1975_v34 = vpop.eup %1974 }
 0x8f8   :  { %v1264_v42 = vmul.f32 %v1975_v34, %v1247_v18  ;;  %vm1269_vm15 = vweird.f32 %v1975_v34 }
 0x8f9   :  { %vm1270_vm2 = vmor %vm1268_vm1, %vm1269_vm15 }
 0x8fa   :  { %v1265_v25 = vsub.f32 1.0, %v1264_v42 }
 0x8fc   :  { %v1266_v36 = vmul.f32 %v1975_v34, %v1265_v25 }
 0x8fe   :  { %v1267_v24 = vadd.f32 %v1975_v34, %v1266_v36 }
 0x900   :  { %v1271_v61 = vsel %vm1270_vm2, %v1975_v34, %v1267_v24 }
 0x901   :  { %v1276_v4 = vsel %vm1273_vm3, %v1275_v59, %v1271_v61 }
 0x902   :  { %v1279_v5 = vmul.f32 %v1276_v4, %v1236_v60 }
 0x904   :  { %v1281_v43 = vadd.f32 %v1279_v5, %v1181_v63 }
 0x906   :  { %1976 = vtanh.f32 %v1281_v43 }
 0x90c   :  { %v1977_v44 = vpop.eup %1976 }
 0x90d   :  { %1288 = vrot.lane.b32.xlu2 %v1977_v44, %s2045_s4 }
 0x95f   :  { %v1287_v6 = vpop.permute.xlu1 %1286 }
 0x960   :  { %v1292_v11 = vsub.f32 %v2900_v40, %v1287_v6 }
 0x962   :  { %v1294_v12 = vmul.f32 %v1292_v11, %v1261_v16 }
 0x964   :  { %v2920_v13 = vadd.f32 %v1294_v12, %v1287_v6 }
 0x966   :  { %1305 = vrot.lane.b32.xlu0 %v2920_v13, %s2045_s4 }
 0x967   :  { %v1289_v14 = vpop.permute.xlu2 %1288 }
 0x968   :  { %v1293_v20 = vsub.f32 %v2905_v31, %v1289_v14 }
 0x96a   :  { %v1295_v32 = vmul.f32 %v1293_v20, %v1276_v4 }
 0x96c   :  { %v2925_v22 = vadd.f32 %v1295_v32, %v1289_v14  ;;  %v1420_v32 = vld [vmem:[#allocation2 + $0xe0] sm:$0xff] }
 0x96e   :  { %1307 = vrot.lane.b32.xlu1 %v2925_v22, %s2045_s4 }
 0x9d8   :  { %v1306_v7 = vpop.permute.xlu0 %1305 }
 0x9d9   :  { %1830 = vmatmul.msk.f32.vlgmr.msra.gmra.mxu0 %vm518_vm0, %v1306_v7  ;;  %1832 = vmatmul.msk.f32.vlgmr.msra.gmra.mxu1 %vm518_vm0, %v1306_v7 }
 0x9e0   :  { %v1308_v40 = vpop.permute.xlu1 %1307 }
 0x9e1   :  { %1831 = vmatmul.msk.f32.gmra.mxu0 %vm518_vm0, %v1308_v40  ;;  %1833 = vmatmul.msk.f32.gmra.mxu1 %vm518_vm0, %v1308_v40 }
 0xa56   :  { %v1330_v8 = vpop.f32.mrf.mxu0  ;;  %v1353_v62 = vpop.f32.mrf.mxu1 }
 0xa57   :  { %v1331_v19 = vadd.f32 %v1330_v8, %v2653_v55  ;;  %v1354_v16 = vadd.f32 %v1353_v62, %v2659_v21 }
 0xa59   :  { %v1359_v31 = vadd.f32 %v1331_v19, %v1299_v30  ;;  %v1422_v19 = vld [vmem:[#allocation2 + $0xf0] sm:$0xff] }
 0xa5b   :  { %v1834_v33 = vmul.f32 -1.442695, %v1359_v31 }
 0xa5d   :  { %1978 = vpow2.f32 %v1834_v33 }
 0xa5e   :  { %v1333_v37 = vpop.f32.mrf.mxu0  ;;  %v1356_v18 = vpop.f32.mrf.mxu1 }
 0xa5f   :  { %v1334_v56 = vadd.f32 %v1333_v37, %v2653_v55  ;;  %v1357_v25 = vadd.f32 %v1356_v18, %v2659_v21  ;;  %v1423_v18 = vld [vmem:[#allocation2 + $0xf8] sm:$0xff] }
 0xa61   :  { %v1360_v58 = vadd.f32 %v1334_v56, %v1301_v57 }
 0xa63   :  { %v1979_v1 = vpop.eup %1978  ;;  %v1835_v2 = vmul.f32 -1.442695, %v1360_v58 }
 0xa64   :  { %v1367_v9 = vadd.f32 1.0, %v1979_v1 }
 0xa65   :  { %1980 = vpow2.f32 %v1835_v2 }
 0xa66   :  { %1982 = vrcp.f32 %v1367_v9  ;;  %v1380_v29 = vand.u32 2147483648, %v1367_v9  ;;  %v1378_v38 = vand.u32 2147483647, %v1367_v9  ;;  %vm1374_vm5 = vweird.f32 %v1367_v9 }
 0xa68   :  { %v1381_v15 = vor.u32 1.1754944e-38, %v1380_v29  ;;  %vm1379_vm7 = vcmp.eq.f32.partialorder %v1378_v38, 8.507059e+37 }
 0xa6b   :  { %v1981_v26 = vpop.eup %1980 }
 0xa6c   :  { %v1983_v35 = vpop.eup %1982  ;;  %v1368_v48 = vadd.f32 1.0, %v1981_v26 }
 0xa6d   :  { %v1370_v10 = vmul.f32 %v1983_v35, %v1367_v9  ;;  %vm1375_vm4 = vweird.f32 %v1983_v35 }
 0xa6e   :  { %1984 = vrcp.f32 %v1368_v48  ;;  %vm1376_vm6 = vmor %vm1374_vm5, %vm1375_vm4  ;;  %v1395_v54 = vand.u32 2147483648, %v1368_v48  ;;  %v1393_v28 = vand.u32 2147483647, %v1368_v48  ;;  %vm1389_vm9 = vweird.f32 %v1368_v48 }
 0xa6f   :  { %v1371_v27 = vsub.f32 1.0, %v1370_v10  ;;  %vm1585_vm5 = vcmask 80896  }
 0xa70   :  { %v1396_v42 = vor.u32 1.1754944e-38, %v1395_v54  ;;  %vm1394_vm11 = vcmp.eq.f32.partialorder %v1393_v28, 8.507059e+37 }
 0xa71   :  { %v1372_v0 = vmul.f32 %v1983_v35, %v1371_v27 }
 0xa73   :  { %v1373_v39 = vadd.f32 %v1983_v35, %v1372_v0 }
 0xa74   :  { %v1985_v41 = vpop.eup %1984 }
 0xa75   :  { %v1377_v45 = vsel %vm1376_vm6, %v1983_v35, %v1373_v39  ;;  %v1385_v46 = vmul.f32 %v1985_v41, %v1368_v48  ;;  %vm1390_vm8 = vweird.f32 %v1985_v41 }
 0xa76   :  { %v1382_v47 = vsel %vm1379_vm7, %v1381_v15, %v1377_v45  ;;  %vm1391_vm10 = vmor %vm1389_vm9, %vm1390_vm8  ;;  %v1421_v15 = vld [vmem:[#allocation2 + $0xe8] sm:$0xff] }
 0xa77   :  { %v1399_v52 = vmul.f32 %v1382_v47, %v1354_v16  ;;  %v1386_v3 = vsub.f32 1.0, %v1385_v46 }
 0xa79   :  { %v1401_v17 = vadd.f32 %v1399_v52, %v1300_v51  ;;  %v1387_v53 = vmul.f32 %v1985_v41, %v1386_v3 }
 0xa7b   :  { %1986 = vtanh.f32 %v1401_v17  ;;  %v1388_v34 = vadd.f32 %v1985_v41, %v1387_v53 }
 0xa7d   :  { %v1392_v50 = vsel %vm1391_vm10, %v1985_v41, %v1388_v34 }
 0xa7e   :  { %v1397_v36 = vsel %vm1394_vm11, %v1396_v42, %v1392_v50  ;;  %v1547_v50 = vld [vmem:[%s3000_s5 + $0x38] sm:$0xff] }
 0xa7f   :  { %v1400_v23 = vmul.f32 %v1397_v36, %v1357_v25  ;;  %1570 = vmatpush.msrb.mxu0 %v1547_v50  ;;  %1892 = vmatpush.msrb.mxu1 %v1547_v50 }
 0xa81   :  { %v1987_v24 = vpop.eup %1986  ;;  %v1402_v59 = vadd.f32 %v1400_v23, %v1302_v49  ;;  %v1544_v23 = vld [vmem:[%s3000_s5 + $0x20] sm:$0xff]  ;;  %v1543_v49 = vld [vmem:[%s3000_s5 + $0x18] sm:$0xff] }
 0xa82   :  { %1407 = vrot.lane.b32.xlu2 %v1987_v24, %s2045_s4  ;;  %v1542_v24 = vld [vmem:[%s3000_s5 + $0x10] sm:$0xff] }
 0xa83   :  { %1988 = vtanh.f32 %v1402_v59  ;;  %v1541_v59 = vld [vmem:[%s3000_s5 + $0x8] sm:$0xff] }
 0xa89   :  { %v1989_v60 = vpop.eup %1988 }
 0xa8a   :  { %1409 = vrot.lane.b32.xlu0 %v1989_v60, %s2045_s4  ;;  %v1540_v60 = vld [vmem:[%s3000_s5] sm:$0xff] }
 0xadc   :  { %v1408_v61 = vpop.permute.xlu2 %1407 }
 0xadd   :  { %v1413_v4 = vsub.f32 %v2920_v13, %v1408_v61 }
 0xadf   :  { %v1415_v5 = vmul.f32 %v1413_v4, %v1382_v47 }
 0xae1   :  { %v2940_v63 = vadd.f32 %v1415_v5, %v1408_v61 }
 0xae3   :  { %1426 = vrot.lane.b32.xlu1 %v2940_v63, %s2045_s4 }
 0xafc   :  { %v1410_v43 = vpop.permute.xlu0 %1409 }
 0xafd   :  { %v1414_v44 = vsub.f32 %v2925_v22, %v1410_v43 }
 0xaff   :  { %v1416_v6 = vmul.f32 %v1414_v44, %v1397_v36  ;;  %v1545_v36 = vld [vmem:[%s3000_s5 + $0x28] sm:$0xff] }
 0xb01   :  { %v2945_v11 = vadd.f32 %v1416_v6, %v1410_v43 }
 0xb03   :  { %1428 = vrot.lane.b32.xlu2 %v2945_v11, %s2045_s4 }
 0xb55   :  { %v1427_v12 = vpop.permute.xlu1 %1426 }
 0xb56   :  { %1836 = vmatmul.msk.f32.vlgmr.msra.gmra.mxu2 %vm518_vm0, %v1427_v12  ;;  %1838 = vmatmul.msk.f32.vlgmr.msra.gmra.mxu3 %vm518_vm0, %v1427_v12 }
 0xb5d   :  { %v1429_v13 = vpop.permute.xlu2 %1428 }
 0xb5e   :  { %1837 = vmatmul.msk.f32.gmra.mxu2 %vm518_vm0, %v1429_v13  ;;  %1839 = vmatmul.msk.f32.gmra.mxu3 %vm518_vm0, %v1429_v13 }
 0xbd9   :  { %v1451_v14 = vpop.f32.mrf.mxu2  ;;  %v1474_v9 = vpop.f32.mrf.mxu3 }
 0xbda   :  { %v1452_v20 = vadd.f32 %v1451_v14, %v2653_v55  ;;  %v1475_v62 = vadd.f32 %v1474_v9, %v2659_v21 }
 0xbdc   :  { %v1480_v22 = vadd.f32 %v1452_v20, %v1420_v32 }
 0xbde   :  { %v1840_v7 = vmul.f32 -1.442695, %v1480_v22 }
 0xbe0   :  { %1990 = vpow2.f32 %v1840_v7 }
 0xbe1   :  { %v1454_v40 = vpop.f32.mrf.mxu2  ;;  %v1477_v52 = vpop.f32.mrf.mxu3 }
 0xbe2   :  { %v1455_v8 = vadd.f32 %v1454_v40, %v2653_v55  ;;  %v1478_v54 = vadd.f32 %v1477_v52, %v2659_v21  ;;  %v1546_v21 = vld [vmem:[%s3000_s5 + $0x30] sm:$0xff] }
 0xbe3   :  { %1571 = vmatpush.msrb.mxu0 %v1546_v21  ;;  %1893 = vmatpush.msrb.mxu1 %v1546_v21 }
 0xbe4   :  { %v1481_v30 = vadd.f32 %v1455_v8, %v1422_v19 }
 0xbe5   :  { %1572 = vmatpush.msrb.mxu0 %v1545_v36  ;;  %1894 = vmatpush.msrb.mxu1 %v1545_v36 }
 0xbe6   :  { %v1991_v31 = vpop.eup %1990  ;;  %v1841_v33 = vmul.f32 -1.442695, %v1481_v30 }
 0xbe7   :  { %v1488_v37 = vadd.f32 1.0, %v1991_v31  ;;  %1573 = vmatpush.msrb.mxu0 %v1544_v23  ;;  %1895 = vmatpush.msrb.mxu1 %v1544_v23 }
 0xbe8   :  { %1992 = vpow2.f32 %v1841_v33 }
 0xbe9   :  { %1994 = vrcp.f32 %v1488_v37  ;;  %v1501_v26 = vand.u32 2147483648, %v1488_v37  ;;  %v1499_v48 = vand.u32 2147483647, %v1488_v37  ;;  %vm1495_vm13 = vweird.f32 %v1488_v37  ;;  %1574 = vmatpush.msrb.mxu0 %v1543_v49  ;;  %1896 = vmatpush.msrb.mxu1 %v1543_v49 }
 0xbeb   :  { %v1502_v27 = vor.u32 1.1754944e-38, %v1501_v26  ;;  %vm1500_vm15 = vcmp.eq.f32.partialorder %v1499_v48, 8.507059e+37  ;;  %1575 = vmatpush.msrb.mxu0 %v1542_v24  ;;  %1897 = vmatpush.msrb.mxu1 %v1542_v24 }
 0xbed   :  { %1576 = vmatpush.msrb.mxu0 %v1541_v59  ;;  %1898 = vmatpush.msrb.mxu1 %v1541_v59 }
 0xbee   :  { %v1993_v56 = vpop.eup %1992 }
 0xbef   :  { %v1995_v57 = vpop.eup %1994  ;;  %v1489_v58 = vadd.f32 1.0, %v1993_v56  ;;  %1577 = vmatpush.msrb.mxu0 %v1540_v60  ;;  %1899 = vmatpush.msrb.mxu1 %v1540_v60 }
 0xbf0   :  { %v1491_v1 = vmul.f32 %v1995_v57, %v1488_v37  ;;  %vm1496_vm12 = vweird.f32 %v1995_v57 }
 0xbf1   :  { %1996 = vrcp.f32 %v1489_v58  ;;  %vm1497_vm14 = vmor %vm1495_vm13, %vm1496_vm12  ;;  %v1516_v16 = vand.u32 2147483648, %v1489_v58  ;;  %v1514_v47 = vand.u32 2147483647, %v1489_v58  ;;  %vm1510_vm2 = vweird.f32 %v1489_v58 }
 0xbf2   :  { %v1492_v2 = vsub.f32 1.0, %v1491_v1 }
 0xbf3   :  { %v1517_v51 = vor.u32 1.1754944e-38, %v1516_v16  ;;  %vm1515_vm4 = vcmp.eq.f32.partialorder %v1514_v47, 8.507059e+37 }
 0xbf4   :  { %v1493_v35 = vmul.f32 %v1995_v57, %v1492_v2 }
 0xbf6   :  { %v1494_v10 = vadd.f32 %v1995_v57, %v1493_v35 }
 0xbf7   :  { %v1997_v55 = vpop.eup %1996 }
 0xbf8   :  { %v1498_v29 = vsel %vm1497_vm14, %v1995_v57, %v1494_v10  ;;  %v1506_v0 = vmul.f32 %v1997_v55, %v1489_v58  ;;  %vm1511_vm1 = vweird.f32 %v1997_v55 }
 0xbf9   :  { %v1503_v38 = vsel %vm1500_vm15, %v1502_v27, %v1498_v29  ;;  %vm1512_vm3 = vmor %vm1510_vm2, %vm1511_vm1 }
 0xbfa   :  { %v1520_v39 = vmul.f32 %v1503_v38, %v1475_v62  ;;  %v1507_v41 = vsub.f32 1.0, %v1506_v0 }
 0xbfc   :  { %v1522_v45 = vadd.f32 %v1520_v39, %v1421_v15  ;;  %v1508_v46 = vmul.f32 %v1997_v55, %v1507_v41 }
 0xbfe   :  { %1998 = vtanh.f32 %v1522_v45  ;;  %v1509_v3 = vadd.f32 %v1997_v55, %v1508_v46 }
 0xc00   :  { %v1513_v17 = vsel %vm1512_vm3, %v1997_v55, %v1509_v3 }
 0xc01   :  { %v1518_v53 = vsel %vm1515_vm4, %v1517_v51, %v1513_v17 }
 0xc02   :  { %v1521_v28 = vmul.f32 %v1518_v53, %v1478_v54 }
 0xc04   :  { %v1999_v34 = vpop.eup %1998  ;;  %v1523_v42 = vadd.f32 %v1521_v28, %v1423_v18 }
 0xc05   :  { %1528 = vrot.lane.b32.xlu0 %v1999_v34, %s2045_s4 }
 0xc06   :  { %2000 = vtanh.f32 %v1523_v42 }
 0xc0c   :  { %v2001_v25 = vpop.eup %2000 }
 0xc0d   :  { %1530 = vrot.lane.b32.xlu1 %v2001_v25, %s2045_s4 }
 0xc77   :  { %v1529_v61 = vpop.permute.xlu0 %1528 }
 0xc78   :  { %v1534_v4 = vsub.f32 %v2940_v63, %v1529_v61  ;;  %v1905_v63 = vld [vmem:[%s3001_s6] ss:$0 sm:$0xff] }
 0xc7a   :  { %v1536_v5 = vmul.f32 %v1534_v4, %v1503_v38 }
 0xc7c   :  { %v1538_v43 = vadd.f32 %v1536_v5, %v1529_v61 }
 0xc7e   :  { %1554 = vrot.lane.b32.xlu2 %v1538_v43, %s2045_s4 }
 0xc7f   :  { %v1531_v44 = vpop.permute.xlu1 %1530 }
 0xc80   :  { %v1535_v6 = vsub.f32 %v2945_v11, %v1531_v44 }
 0xc82   :  { %v1537_v12 = vmul.f32 %v1535_v6, %v1518_v53 }
 0xc84   :  { %v1539_v13 = vadd.f32 %v1537_v12, %v1531_v44 }
 0xc86   :  { %1556 = vrot.lane.b32.xlu0 %v1539_v13, %s2045_s4  ;;  %s1594_s4 = sshll.u32 %s3002_s7, 4  ;;  %s1595_s4 = int_to_ptr.hbm [resolvable:$true] %s1594_s4 }
 0xcd8   :  { %v1555_v14 = vpop.permute.xlu2 %1554 }
 0xcd9   :  { %1842 = vmatmul.msk.f32.vlgmr.msrb.gmra.mxu0 %vm518_vm0, %v1555_v14 }
 0xcf8   :  { %v1557_v20 = vpop.permute.xlu0 %1556 }
 0xcf9   :  { %1843 = vmatmul.msk.f32.vlgmr.msrb.gmra.mxu1 %vm518_vm0, %v1557_v20 }
 0xd56   :  { %v1579_v32 = vpop.f32.mrf.mxu0 }
 0xd57   :  { %v1580_v22 = vadd.f32 %v1905_v63, %v1579_v32 }
 0xd59   :  { %1586 = vst.msk [vmem:[#allocation3] sm:$0xff] %vm1585_vm5, %v1580_v22 }
 0xd76   :  { %v1582_v11 = vpop.f32.mrf.mxu1 }
 0xd77   :  { %v1583_v7 = vadd.f32 %v1905_v63, %v1582_v11 }
 0xd79   :  { %1587 = vst.msk [vmem:[#allocation3 + $0x8] sm:$0xff] %vm1585_vm5, %v1583_v7 }
 0xd7a   :  { %1600 = dma.vmem_to_hbm [thread:$0]  %s1593_s17, 256, %s1595_s4, [#allocation4], %s2047_s19, %s2047_s19, %s2048_s20  }
 0xd7b   :  { %2042 = dma.done.wait [#allocation4], 256  }
 0xd7c   :  { %2043 = vsyncadd [#allocation4], 4294967040 }
 0xd7d   :  { %1605 = vsyncpa [#allocation4], 1 }

</bundles_post_ra>
